<compile_context>
chip_gen: v5e
topology: v5e:2x2
jax: 0.10.0
libtpu: 0.0.40
codegen_flags: <defaults>
</compile_context>

<pallas_src>
import math
import functools

import jax
import jax.numpy as jnp
from jax.experimental import pallas as pl
from jax.experimental.pallas import tpu as pltpu


# ----------------------------- kernel ---------------------------------------

def _layernorm(y, gamma, beta, eps=1e-5):
    # PyTorch nn.LayerNorm over last dim: biased variance, eps inside the rsqrt.
    mu = jnp.mean(y, axis=-1, keepdims=True)
    d = y - mu                                    # computed once, reused (saves a (R,C) VALU pass)
    var = jnp.mean(d * d, axis=-1, keepdims=True)
    return d * jax.lax.rsqrt(var + eps) * gamma + beta


def encoder_layer_kernel(
    x_ref,                     # (R, C) activations, R = batch_block * T
    wqkv_ref, bqkv_ref,        # fused QKV projection (1/sqrt(dk) folded into the Q columns)
    wo_ref,                    # (H*dv, C) output projection (2-D -> ONE matmul)
    w1_ref, b1_ref, w2_ref,    # FFN
    vecs_ref,                  # (6, C): [bo, g1, be1, b2, g2, be2]
    out_ref,                   # (R, C)
    qkv_scr,                   # VMEM scratch (R, 2*H*dk + H*dv) f32
    o_scr,                     # VMEM scratch (R, H*dv) f32
    *, batch_block, seq_len, num_heads, qk_length, value_length, mm_dtype,
):
    H, dk, dv, T = num_heads, qk_length, value_length, seq_len

    x = x_ref[...]                                # (R, C) f32
    vecs = vecs_ref[...]                          # (6, C) f32
    bo, g1, be1, b2, g2, be2 = (vecs[i:i + 1, :] for i in range(6))

    # ---- fused Q/K/V projection: one (R,C)x(C, 2*H*dk + H*dv) MXU matmul, f32 accumulation ----
    qkv = jnp.dot(x.astype(mm_dtype), wqkv_ref[...],
                  preferred_element_type=jnp.float32) + bqkv_ref[...]
    qkv_scr[...] = qkv                            # stage in VMEM; the big value goes dead here

    q_off, k_off, v_off = 0, H * dk, 2 * H * dk

    # ---- attention: heads load only their own ref slice, write into the (R, H*dv) scratch ----
    for b in range(batch_block):                  # static unroll (small)
        r0 = b * T
        for h in range(H):                        # static unroll
            qh = qkv_scr[r0:r0 + T, q_off + h * dk: q_off + (h + 1) * dk].astype(mm_dtype)
            kh = qkv_scr[r0:r0 + T, k_off + h * dk: k_off + (h + 1) * dk].astype(mm_dtype)
            vh = qkv_scr[r0:r0 + T, v_off + h * dv: v_off + (h + 1) * dv].astype(mm_dtype)

            # scores (q already scaled); contraction on last dims -> no explicit transpose
            s = jnp.einsum("td,sd->ts", qh, kh,
                           preferred_element_type=jnp.float32)            # (T, T) f32
            s = s - jnp.max(s, axis=-1, keepdims=True)
            p = jnp.exp(s)
            p = p * pl.reciprocal(jnp.sum(p, axis=-1, keepdims=True), approx=True)  # EUP vrcp

            o_scr[r0:r0 + T, h * dv:(h + 1) * dv] = jnp.dot(
                p.astype(mm_dtype), vh, preferred_element_type=jnp.float32)         # (T, dv)

    # ---- ONE output-projection matmul over the whole row block ----
    attn = jnp.dot(o_scr[...].astype(mm_dtype), wo_ref[...],
                   preferred_element_type=jnp.float32) + bo               # (R, C)

    # ---- out2 = x + LayerNorm1(attention(x, x, x)) ----
    out2 = x + _layernorm(attn, g1, be1)

    # ---- FFN: Linear -> ReLU -> Linear ----
    h1 = jnp.dot(out2.astype(mm_dtype), w1_ref[...],
                 preferred_element_type=jnp.float32) + b1_ref[...]
    h1 = jnp.maximum(h1, 0.0)
    out3 = jnp.dot(h1.astype(mm_dtype), w2_ref[...],
                   preferred_element_type=jnp.float32) + b2

    # dropout == identity (eval mode)

    # ---- out4 = out2 + LayerNorm2(out3) ----
    out_ref[...] = (out2 + _layernorm(out3, g2, be2)).astype(out_ref.dtype)


# ----------------------------- wrapper ---------------------------------------

def _auto_batch_block(batch, seq_len, target_rows=256):
    """Pack batch elements per grid step to fill MXU rows, while keeping >=2 parallel grid steps
    when the batch allows (megacore on v5e/v6e, 2 TensorCores on v7x)."""
    divisors = [d for d in range(1, batch + 1) if batch % d == 0]
    ok = [d for d in divisors if d * seq_len <= max(target_rows, seq_len)]
    best = max(ok) if ok else 1
    if best == batch and batch > 1:
        proper = [d for d in ok if d < batch]
        if proper:
            best = max(proper)
    return best


def encoder_layer(x, params, *, num_heads, qk_length, value_length,
                  mm_dtype=None, batch_block=None, single_buffer_weights=True):
    """Pallas TPU EncoderLayer forward.

    mm_dtype: dtype of the MXU matmul *operands*. jnp.bfloat16 is a good choice on ALL of
    v5e / v6e / v7x (full-rate bf16 MXU, half the weight DMA bytes); accumulation, softmax and
    LayerNorm statistics always stay float32. Default: x.dtype (exact f32 path).
    """
    B, T, C = x.shape
    H, dk, dv = num_heads, qk_length, value_length
    mm_dtype = jnp.dtype(x.dtype) if mm_dtype is None else jnp.dtype(mm_dtype)

    b_blk = _auto_batch_block(B, T) if batch_block is None else int(batch_block)
    assert B % b_blk == 0, "batch_block must divide the batch"
    R = b_blk * T
    n_blocks = B // b_blk
    qkv_w = 2 * H * dk + H * dv

    # ---- wrapper-side parameter fusion (pure layout plumbing) ----
    scale = 1.0 / math.sqrt(dk)                  # folded into Q columns: no in-kernel multiply
    wqkv = jnp.concatenate([params["wq"] * scale, params["wk"], params["wv"]],
                           axis=1).astype(mm_dtype)                      # (C, qkv_w)
    bqkv = jnp.concatenate([params["bq"] * scale, params["bk"], params["bv"]],
                           axis=1).astype(jnp.float32)                   # (1, qkv_w)
    wo = params["wo"].astype(mm_dtype)                                   # (H*dv, C)
    w1 = params["w1"].astype(mm_dtype)
    b1 = params["b1"].astype(jnp.float32)
    w2 = params["w2"].astype(mm_dtype)
    vecs = jnp.concatenate([params["bo"], params["g1"], params["be1"],
                            params["b2"], params["g2"], params["be2"]],
                           axis=0).astype(jnp.float32)                   # (6, C)

    x2 = x.reshape(B * T, C)
    args = (x2, wqkv, bqkv, wo, w1, b1, w2, vecs)

    # ---- VMEM budget derived from the actual tile / weight / scratch sizes ----
    itemsize = jnp.dtype(x.dtype).itemsize
    act_bytes = 2 * 2 * R * C * itemsize                               # in + out, double-buffered
    weight_bytes = 2 * sum(int(a.size) * jnp.dtype(a.dtype).itemsize for a in args[1:])
    scratch_bytes = 4 * R * (qkv_w + H * dv)                           # f32 scratches
    derived = act_bytes + weight_bytes + scratch_bytes + (8 << 20)     # + headroom
    try:
        phys = int(getattr(pltpu.get_tpu_info(), "vmem_capacity_bytes", 64 << 20))
    except Exception:
        phys = 64 << 20                                                # v7x-safe fallback
    cap = int(phys * 0.8)                                              # leave ~20% headroom
    vmem_limit = max(min(max(derived, 32 << 20), cap), derived)

    kernel = functools.partial(
        encoder_layer_kernel,
        batch_block=b_blk, seq_len=T, num_heads=H,
        qk_length=dk, value_length=dv, mm_dtype=mm_dtype,
    )

    def build(buffer_weights_once):
        def const_spec(a):
            idx = (0,) * a.ndim
            if buffer_weights_once:
                # Constant weights: index_map never changes -> single-buffer, halves their VMEM.
                return pl.BlockSpec(a.shape, lambda i, _idx=idx: _idx,
                                    pipeline_mode=pl.Buffered(1))
            return pl.BlockSpec(a.shape, lambda i, _idx=idx: _idx)

        in_specs = [pl.BlockSpec((R, C), lambda i: (i, 0))]
        in_specs += [const_spec(a) for a in args[1:]]
        out_spec = pl.BlockSpec((R, C), lambda i: (i, 0))

        return pl.pallas_call(
            kernel,
            out_shape=jax.ShapeDtypeStruct((B * T, C), x.dtype),
            grid=(n_blocks,),
            in_specs=in_specs,
            out_specs=out_spec,
            scratch_shapes=[
                pltpu.VMEM((R, qkv_w), jnp.float32),
                pltpu.VMEM((R, H * dv), jnp.float32),
            ],
            compiler_params=pltpu.CompilerParams(
                dimension_semantics=("parallel",),
                vmem_limit_bytes=int(vmem_limit),
            ),
        )

    if single_buffer_weights:
        try:
            out2d = build(True)(*args)
        except Exception:
            # pipeline_mode=pl.Buffered(1) rejected by this JAX build -> default double-buffering.
            out2d = build(False)(*args)
    else:
        out2d = build(False)(*args)

    return out2d.reshape(B, T, C)


# ----------------------------- reference (pure JAX) ---------------------------

def encoder_layer_ref(x, p, *, num_heads, qk_length, value_length):
    def ln(y, g, b, eps=1e-5):
        mu = jnp.mean(y, axis=-1, keepdims=True)
        var = jnp.mean((y - mu) ** 2, axis=-1, keepdims=True)
        return (y - mu) / jnp.sqrt(var + eps) * g + b

    B, T, C = x.shape
    q = x @ p["wq"] + p["bq"]
    k = x @ p["wk"] + p["bk"]
    v = x @ p["wv"] + p["bv"]
    q = q.reshape(B, T, num_heads, qk_length).transpose(0, 2, 1, 3)
    k = k.reshape(B, T, num_heads, qk_length).transpose(0, 2, 1, 3)
    v = v.reshape(B, T, num_heads, value_length).transpose(0, 2, 1, 3)
    s = jnp.einsum("bhqd,bhkd->bhqk", q, k) / math.sqrt(qk_length)
    a = jax.nn.softmax(s, axis=-1)
    o = jnp.einsum("bhqk,bhkd->bhqd", a, v).transpose(0, 2, 1, 3).reshape(B, T, -1)
    attn_out = o @ p["wo"] + p["bo"]
    out2 = x + ln(attn_out, p["g1"], p["be1"])
    h1 = jnp.maximum(out2 @ p["w1"] + p["b1"], 0.0)
    out3 = h1 @ p["w2"] + p["b2"]
    return out2 + ln(out3, p["g2"], p["be2"])


# ----------------------------- main -------------------------------------------

if __name__ == "__main__":
    B, T, C = 2, 8, 32          # batch, seq, embedding_dim
    H, QK, VL = 4, 8, 8         # num_heads, qk_length, value_length
    F = 64                      # ffn_hidden_dim
    dropout = 0.1               # identity in eval mode

    key = jax.random.PRNGKey(0)
    keys = jax.random.split(key, 16)

    def w(k, shape, scale=0.02):
        return (scale * jax.random.normal(k, shape)).astype(jnp.float32)

    params = {
        "wq": w(keys[0], (C, H * QK)),  "bq": w(keys[1], (1, H * QK)),
        "wk": w(keys[2], (C, H * QK)),  "bk": w(keys[3], (1, H * QK)),
        "wv": w(keys[4], (C, H * VL)),  "bv": w(keys[5], (1, H * VL)),
        "wo": w(keys[6], (H * VL, C)),  "bo": w(keys[7], (1, C)),
        "g1": jnp.ones((1, C), jnp.float32), "be1": jnp.zeros((1, C), jnp.float32),
        "w1": w(keys[8], (C, F)),       "b1": w(keys[9], (1, F)),
        "w2": w(keys[10], (F, C)),      "b2": w(keys[11], (1, C)),
        "g2": jnp.ones((1, C), jnp.float32), "be2": jnp.zeros((1, C), jnp.float32),
    }

    x = jax.random.normal(keys[12], (B, T, C), dtype=jnp.float32)
    ref = encoder_layer_ref(x, params, num_heads=H, qk_length=QK, value_length=VL)

    # f32 MXU operands; auto batch_block keeps 2 parallel grid steps at this toy batch.
    out = encoder_layer(x, params, num_heads=H, qk_length=QK, value_length=VL)
    out = jax.block_until_ready(out)
    assert out.shape == (B, T, C)
    assert jnp.allclose(out, ref, atol=5e-3, rtol=5e-3), "f32 kernel mismatch vs JAX reference"

    # bf16 MXU operands (good on v5e/v6e/v7x) + both batch elements packed into one row block
    # (exercises the blocked-rows path). Accumulation / softmax / LayerNorm remain f32.
    out_bf16 = encoder_layer(x, params, num_heads=H, qk_length=QK, value_length=VL,
                             mm_dtype=jnp.bfloat16, batch_block=2)
    out_bf16 = jax.block_until_ready(out_bf16)
    assert out_bf16.shape == (B, T, C)
    assert jnp.allclose(out_bf16, ref, atol=5e-2, rtol=5e-2), "bf16 kernel mismatch vs JAX reference"

    print("KERNEL_OK")
</pallas_src>

<mosaic_0001>
module attributes {stable_mosaic.version = 11 : i64} {
  func.func @encoder_layer_kernel(%arg0: i32, %arg1: memref<8x32xf32, #tpu.memory_space<vmem>>, %arg2: memref<32x96xf32, #tpu.memory_space<vmem>>, %arg3: memref<1x96xf32, #tpu.memory_space<vmem>>, %arg4: memref<32x32xf32, #tpu.memory_space<vmem>>, %arg5: memref<32x64xf32, #tpu.memory_space<vmem>>, %arg6: memref<1x64xf32, #tpu.memory_space<vmem>>, %arg7: memref<64x32xf32, #tpu.memory_space<vmem>>, %arg8: memref<6x32xf32, #tpu.memory_space<vmem>>, %arg9: memref<8x32xf32, #tpu.memory_space<vmem>>, %arg10: memref<8x96xf32, #tpu.memory_space<vmem>>, %arg11: memref<8x32xf32, #tpu.memory_space<vmem>>) attributes {dimension_semantics = [#tpu.dimension_semantics<parallel>], iteration_bounds = array<i64: 2>, scalar_prefetch = 0 : i64, scratch_operands = 2 : i64, tpu.core_type = #tpu.core_type<tc>, window_params = [{transform_indices = @transform_0, window_bounds = array<i64: 8, 32>}, {pipeline_mode = #tpu.pipeline_mode<synchronous>, transform_indices = @transform_1, window_bounds = array<i64: 32, 96>}, {pipeline_mode = #tpu.pipeline_mode<synchronous>, transform_indices = @transform_2, window_bounds = array<i64: 1, 96>}, {pipeline_mode = #tpu.pipeline_mode<synchronous>, transform_indices = @transform_3, window_bounds = array<i64: 32, 32>}, {pipeline_mode = #tpu.pipeline_mode<synchronous>, transform_indices = @transform_4, window_bounds = array<i64: 32, 64>}, {pipeline_mode = #tpu.pipeline_mode<synchronous>, transform_indices = @transform_5, window_bounds = array<i64: 1, 64>}, {pipeline_mode = #tpu.pipeline_mode<synchronous>, transform_indices = @transform_6, window_bounds = array<i64: 64, 32>}, {pipeline_mode = #tpu.pipeline_mode<synchronous>, transform_indices = @transform_7, window_bounds = array<i64: 6, 32>}, {transform_indices = @transform_8, window_bounds = array<i64: 8, 32>}]} {
    %c0 = arith.constant 0 : index
    %c0_0 = arith.constant 0 : index
    %0 = vector.load %arg1[%c0, %c0_0] : memref<8x32xf32, #tpu.memory_space<vmem>>, vector<8x32xf32>
    %c0_1 = arith.constant 0 : index
    %c0_2 = arith.constant 0 : index
    %1 = vector.load %arg8[%c0_1, %c0_2] : memref<6x32xf32, #tpu.memory_space<vmem>>, vector<6x32xf32>
    %2 = vector.extract_strided_slice %1 {offsets = [0, 0], sizes = [1, 32], strides = [1, 1]} : vector<6x32xf32> to vector<1x32xf32>
    %3 = vector.extract_strided_slice %1 {offsets = [1, 0], sizes = [1, 32], strides = [1, 1]} : vector<6x32xf32> to vector<1x32xf32>
    %4 = vector.extract_strided_slice %1 {offsets = [2, 0], sizes = [1, 32], strides = [1, 1]} : vector<6x32xf32> to vector<1x32xf32>
    %5 = vector.extract_strided_slice %1 {offsets = [3, 0], sizes = [1, 32], strides = [1, 1]} : vector<6x32xf32> to vector<1x32xf32>
    %6 = vector.extract_strided_slice %1 {offsets = [4, 0], sizes = [1, 32], strides = [1, 1]} : vector<6x32xf32> to vector<1x32xf32>
    %7 = vector.extract_strided_slice %1 {offsets = [5, 0], sizes = [1, 32], strides = [1, 1]} : vector<6x32xf32> to vector<1x32xf32>
    %c0_3 = arith.constant 0 : index
    %c0_4 = arith.constant 0 : index
    %8 = vector.load %arg2[%c0_3, %c0_4] : memref<32x96xf32, #tpu.memory_space<vmem>>, vector<32x96xf32>
    %cst = arith.constant dense<0.000000e+00> : vector<8x96xf32>
    %9 = tpu.matmul %0, %8, %cst {dimension_numbers = #tpu.dot_dimension_numbers<[1], [0], [0], [1], [0, 0, 1, 1], [], []>} : vector<8x32xf32>, vector<32x96xf32>, vector<8x96xf32> -> vector<8x96xf32>
    %c0_5 = arith.constant 0 : index
    %c0_6 = arith.constant 0 : index
    %10 = vector.load %arg3[%c0_5, %c0_6] : memref<1x96xf32, #tpu.memory_space<vmem>>, vector<1x96xf32>
    %11 = vector.broadcast %10 : vector<1x96xf32> to vector<8x96xf32>
    %12 = arith.addf %9, %11 : vector<8x96xf32>
    %c0_7 = arith.constant 0 : index
    %c0_8 = arith.constant 0 : index
    %13 = vector.load %arg10[%c0_7, %c0_8] : memref<8x96xf32, #tpu.memory_space<vmem>>, vector<8x96xf32>
    tpu.vector_store %arg10[%c0_7, %c0_8], %12 {strides = array<i32>} : memref<8x96xf32, #tpu.memory_space<vmem>>, vector<8x96xf32>,
    %c0_9 = arith.constant 0 : index
    %c0_10 = arith.constant 0 : index
    %14 = vector.load %arg10[%c0_9, %c0_10] : memref<8x96xf32, #tpu.memory_space<vmem>>, vector<8x8xf32>
    %c0_11 = arith.constant 0 : index
    %c32 = arith.constant 32 : index
    %15 = vector.load %arg10[%c0_11, %c32] : memref<8x96xf32, #tpu.memory_space<vmem>>, vector<8x8xf32>
    %c0_12 = arith.constant 0 : index
    %c64 = arith.constant 64 : index
    %16 = vector.load %arg10[%c0_12, %c64] : memref<8x96xf32, #tpu.memory_space<vmem>>, vector<8x8xf32>
    "tpu.trace_start"() <{level = 10 : i32, message = "td,sd->ts"}> : () -> ()
    %cst_13 = arith.constant dense<0.000000e+00> : vector<8x8xf32>
    %17 = tpu.matmul %14, %15, %cst_13 {dimension_numbers = #tpu.dot_dimension_numbers<[1], [1], [0], [0], [0, 0, 1, 0], [], []>} : vector<8x8xf32>, vector<8x8xf32>, vector<8x8xf32> -> vector<8x8xf32>
    "tpu.trace_stop"() : () -> ()
    %cst_14 = arith.constant dense<0xFF800000> : vector<8xf32>
    %18 = vector.multi_reduction <maximumf>, %17, %cst_14 [1] : vector<8x8xf32> to vector<8xf32>
    %19 = vector.shape_cast %18 : vector<8xf32> to vector<8x1xf32>
    %20 = vector.broadcast %19 : vector<8x1xf32> to vector<8x8xf32>
    %21 = arith.subf %17, %20 : vector<8x8xf32>
    %22 = math.exp %21 : vector<8x8xf32>
    %cst_15 = arith.constant dense<0.000000e+00> : vector<8xf32>
    %23 = vector.multi_reduction <add>, %22, %cst_15 [1] : vector<8x8xf32> to vector<8xf32>
    %24 = vector.shape_cast %23 : vector<8xf32> to vector<8x1xf32>
    %25 = tpu.reciprocal %24 {approx = true} : vector<8x1xf32> -> vector<8x1xf32>
    %26 = vector.broadcast %25 : vector<8x1xf32> to vector<8x8xf32>
    %27 = arith.mulf %22, %26 : vector<8x8xf32>
    %cst_16 = arith.constant dense<0.000000e+00> : vector<8x8xf32>
    %28 = tpu.matmul %27, %16, %cst_16 {dimension_numbers = #tpu.dot_dimension_numbers<[1], [0], [0], [1], [0, 0, 1, 1], [], []>} : vector<8x8xf32>, vector<8x8xf32>, vector<8x8xf32> -> vector<8x8xf32>
    %c0_17 = arith.constant 0 : index
    %c0_18 = arith.constant 0 : index
    %29 = vector.load %arg11[%c0_17, %c0_18] : memref<8x32xf32, #tpu.memory_space<vmem>>, vector<8x8xf32>
    tpu.vector_store %arg11[%c0_17, %c0_18], %28 {strides = array<i32>} : memref<8x32xf32, #tpu.memory_space<vmem>>, vector<8x8xf32>,
    %c0_19 = arith.constant 0 : index
    %c8 = arith.constant 8 : index
    %30 = vector.load %arg10[%c0_19, %c8] : memref<8x96xf32, #tpu.memory_space<vmem>>, vector<8x8xf32>
    %c0_20 = arith.constant 0 : index
    %c40 = arith.constant 40 : index
    %31 = vector.load %arg10[%c0_20, %c40] : memref<8x96xf32, #tpu.memory_space<vmem>>, vector<8x8xf32>
    %c0_21 = arith.constant 0 : index
    %c72 = arith.constant 72 : index
    %32 = vector.load %arg10[%c0_21, %c72] : memref<8x96xf32, #tpu.memory_space<vmem>>, vector<8x8xf32>
    "tpu.trace_start"() <{level = 10 : i32, message = "td,sd->ts"}> : () -> ()
    %cst_22 = arith.constant dense<0.000000e+00> : vector<8x8xf32>
    %33 = tpu.matmul %30, %31, %cst_22 {dimension_numbers = #tpu.dot_dimension_numbers<[1], [1], [0], [0], [0, 0, 1, 0], [], []>} : vector<8x8xf32>, vector<8x8xf32>, vector<8x8xf32> -> vector<8x8xf32>
    "tpu.trace_stop"() : () -> ()
    %cst_23 = arith.constant dense<0xFF800000> : vector<8xf32>
    %34 = vector.multi_reduction <maximumf>, %33, %cst_23 [1] : vector<8x8xf32> to vector<8xf32>
    %35 = vector.shape_cast %34 : vector<8xf32> to vector<8x1xf32>
    %36 = vector.broadcast %35 : vector<8x1xf32> to vector<8x8xf32>
    %37 = arith.subf %33, %36 : vector<8x8xf32>
    %38 = math.exp %37 : vector<8x8xf32>
    %cst_24 = arith.constant dense<0.000000e+00> : vector<8xf32>
    %39 = vector.multi_reduction <add>, %38, %cst_24 [1] : vector<8x8xf32> to vector<8xf32>
    %40 = vector.shape_cast %39 : vector<8xf32> to vector<8x1xf32>
    %41 = tpu.reciprocal %40 {approx = true} : vector<8x1xf32> -> vector<8x1xf32>
    %42 = vector.broadcast %41 : vector<8x1xf32> to vector<8x8xf32>
    %43 = arith.mulf %38, %42 : vector<8x8xf32>
    %cst_25 = arith.constant dense<0.000000e+00> : vector<8x8xf32>
    %44 = tpu.matmul %43, %32, %cst_25 {dimension_numbers = #tpu.dot_dimension_numbers<[1], [0], [0], [1], [0, 0, 1, 1], [], []>} : vector<8x8xf32>, vector<8x8xf32>, vector<8x8xf32> -> vector<8x8xf32>
    %c0_26 = arith.constant 0 : index
    %c8_27 = arith.constant 8 : index
    %45 = vector.load %arg11[%c0_26, %c8_27] : memref<8x32xf32, #tpu.memory_space<vmem>>, vector<8x8xf32>
    tpu.vector_store %arg11[%c0_26, %c8_27], %44 {strides = array<i32>} : memref<8x32xf32, #tpu.memory_space<vmem>>, vector<8x8xf32>,
    %c0_28 = arith.constant 0 : index
    %c16 = arith.constant 16 : index
    %46 = vector.load %arg10[%c0_28, %c16] : memref<8x96xf32, #tpu.memory_space<vmem>>, vector<8x8xf32>
    %c0_29 = arith.constant 0 : index
    %c48 = arith.constant 48 : index
    %47 = vector.load %arg10[%c0_29, %c48] : memref<8x96xf32, #tpu.memory_space<vmem>>, vector<8x8xf32>
    %c0_30 = arith.constant 0 : index
    %c80 = arith.constant 80 : index
    %48 = vector.load %arg10[%c0_30, %c80] : memref<8x96xf32, #tpu.memory_space<vmem>>, vector<8x8xf32>
    "tpu.trace_start"() <{level = 10 : i32, message = "td,sd->ts"}> : () -> ()
    %cst_31 = arith.constant dense<0.000000e+00> : vector<8x8xf32>
    %49 = tpu.matmul %46, %47, %cst_31 {dimension_numbers = #tpu.dot_dimension_numbers<[1], [1], [0], [0], [0, 0, 1, 0], [], []>} : vector<8x8xf32>, vector<8x8xf32>, vector<8x8xf32> -> vector<8x8xf32>
    "tpu.trace_stop"() : () -> ()
    %cst_32 = arith.constant dense<0xFF800000> : vector<8xf32>
    %50 = vector.multi_reduction <maximumf>, %49, %cst_32 [1] : vector<8x8xf32> to vector<8xf32>
    %51 = vector.shape_cast %50 : vector<8xf32> to vector<8x1xf32>
    %52 = vector.broadcast %51 : vector<8x1xf32> to vector<8x8xf32>
    %53 = arith.subf %49, %52 : vector<8x8xf32>
    %54 = math.exp %53 : vector<8x8xf32>
    %cst_33 = arith.constant dense<0.000000e+00> : vector<8xf32>
    %55 = vector.multi_reduction <add>, %54, %cst_33 [1] : vector<8x8xf32> to vector<8xf32>
    %56 = vector.shape_cast %55 : vector<8xf32> to vector<8x1xf32>
    %57 = tpu.reciprocal %56 {approx = true} : vector<8x1xf32> -> vector<8x1xf32>
    %58 = vector.broadcast %57 : vector<8x1xf32> to vector<8x8xf32>
    %59 = arith.mulf %54, %58 : vector<8x8xf32>
    %cst_34 = arith.constant dense<0.000000e+00> : vector<8x8xf32>
    %60 = tpu.matmul %59, %48, %cst_34 {dimension_numbers = #tpu.dot_dimension_numbers<[1], [0], [0], [1], [0, 0, 1, 1], [], []>} : vector<8x8xf32>, vector<8x8xf32>, vector<8x8xf32> -> vector<8x8xf32>
    %c0_35 = arith.constant 0 : index
    %c16_36 = arith.constant 16 : index
    %61 = vector.load %arg11[%c0_35, %c16_36] : memref<8x32xf32, #tpu.memory_space<vmem>>, vector<8x8xf32>
    tpu.vector_store %arg11[%c0_35, %c16_36], %60 {strides = array<i32>} : memref<8x32xf32, #tpu.memory_space<vmem>>, vector<8x8xf32>,
    %c0_37 = arith.constant 0 : index
    %c24 = arith.constant 24 : index
    %62 = vector.load %arg10[%c0_37, %c24] : memref<8x96xf32, #tpu.memory_space<vmem>>, vector<8x8xf32>
    %c0_38 = arith.constant 0 : index
    %c56 = arith.constant 56 : index
    %63 = vector.load %arg10[%c0_38, %c56] : memref<8x96xf32, #tpu.memory_space<vmem>>, vector<8x8xf32>
    %c0_39 = arith.constant 0 : index
    %c88 = arith.constant 88 : index
    %64 = vector.load %arg10[%c0_39, %c88] : memref<8x96xf32, #tpu.memory_space<vmem>>, vector<8x8xf32>
    "tpu.trace_start"() <{level = 10 : i32, message = "td,sd->ts"}> : () -> ()
    %cst_40 = arith.constant dense<0.000000e+00> : vector<8x8xf32>
    %65 = tpu.matmul %62, %63, %cst_40 {dimension_numbers = #tpu.dot_dimension_numbers<[1], [1], [0], [0], [0, 0, 1, 0], [], []>} : vector<8x8xf32>, vector<8x8xf32>, vector<8x8xf32> -> vector<8x8xf32>
    "tpu.trace_stop"() : () -> ()
    %cst_41 = arith.constant dense<0xFF800000> : vector<8xf32>
    %66 = vector.multi_reduction <maximumf>, %65, %cst_41 [1] : vector<8x8xf32> to vector<8xf32>
    %67 = vector.shape_cast %66 : vector<8xf32> to vector<8x1xf32>
    %68 = vector.broadcast %67 : vector<8x1xf32> to vector<8x8xf32>
    %69 = arith.subf %65, %68 : vector<8x8xf32>
    %70 = math.exp %69 : vector<8x8xf32>
    %cst_42 = arith.constant dense<0.000000e+00> : vector<8xf32>
    %71 = vector.multi_reduction <add>, %70, %cst_42 [1] : vector<8x8xf32> to vector<8xf32>
    %72 = vector.shape_cast %71 : vector<8xf32> to vector<8x1xf32>
    %73 = tpu.reciprocal %72 {approx = true} : vector<8x1xf32> -> vector<8x1xf32>
    %74 = vector.broadcast %73 : vector<8x1xf32> to vector<8x8xf32>
    %75 = arith.mulf %70, %74 : vector<8x8xf32>
    %cst_43 = arith.constant dense<0.000000e+00> : vector<8x8xf32>
    %76 = tpu.matmul %75, %64, %cst_43 {dimension_numbers = #tpu.dot_dimension_numbers<[1], [0], [0], [1], [0, 0, 1, 1], [], []>} : vector<8x8xf32>, vector<8x8xf32>, vector<8x8xf32> -> vector<8x8xf32>
    %c0_44 = arith.constant 0 : index
    %c24_45 = arith.constant 24 : index
    %77 = vector.load %arg11[%c0_44, %c24_45] : memref<8x32xf32, #tpu.memory_space<vmem>>, vector<8x8xf32>
    tpu.vector_store %arg11[%c0_44, %c24_45], %76 {strides = array<i32>} : memref<8x32xf32, #tpu.memory_space<vmem>>, vector<8x8xf32>,
    %c0_46 = arith.constant 0 : index
    %c0_47 = arith.constant 0 : index
    %78 = vector.load %arg11[%c0_46, %c0_47] : memref<8x32xf32, #tpu.memory_space<vmem>>, vector<8x32xf32>
    %c0_48 = arith.constant 0 : index
    %c0_49 = arith.constant 0 : index
    %79 = vector.load %arg4[%c0_48, %c0_49] : memref<32x32xf32, #tpu.memory_space<vmem>>, vector<32x32xf32>
    %cst_50 = arith.constant dense<0.000000e+00> : vector<8x32xf32>
    %80 = tpu.matmul %78, %79, %cst_50 {dimension_numbers = #tpu.dot_dimension_numbers<[1], [0], [0], [1], [0, 0, 1, 1], [], []>} : vector<8x32xf32>, vector<32x32xf32>, vector<8x32xf32> -> vector<8x32xf32>
    %81 = vector.broadcast %2 : vector<1x32xf32> to vector<8x32xf32>
    %82 = arith.addf %80, %81 : vector<8x32xf32>
    %cst_51 = arith.constant dense<0.000000e+00> : vector<8xf32>
    %83 = vector.multi_reduction <add>, %82, %cst_51 [1] : vector<8x32xf32> to vector<8xf32>
    %84 = vector.shape_cast %83 : vector<8xf32> to vector<8x1xf32>
    %cst_52 = arith.constant 3.200000e+01 : f32
    %85 = vector.broadcast %cst_52 : f32 to vector<8x1xf32>
    %86 = arith.divf %84, %85 : vector<8x1xf32>
    %87 = vector.broadcast %86 : vector<8x1xf32> to vector<8x32xf32>
    %88 = arith.subf %82, %87 : vector<8x32xf32>
    %89 = arith.mulf %88, %88 : vector<8x32xf32>
    %cst_53 = arith.constant dense<0.000000e+00> : vector<8xf32>
    %90 = vector.multi_reduction <add>, %89, %cst_53 [1] : vector<8x32xf32> to vector<8xf32>
    %91 = vector.shape_cast %90 : vector<8xf32> to vector<8x1xf32>
    %cst_54 = arith.constant 3.200000e+01 : f32
    %92 = vector.broadcast %cst_54 : f32 to vector<8x1xf32>
    %93 = arith.divf %91, %92 : vector<8x1xf32>
    %cst_55 = arith.constant 9.99999974E-6 : f32
    %94 = vector.broadcast %cst_55 : f32 to vector<8x1xf32>
    %95 = arith.addf %93, %94 : vector<8x1xf32>
    %96 = math.rsqrt %95 : vector<8x1xf32>
    %97 = vector.broadcast %96 : vector<8x1xf32> to vector<8x32xf32>
    %98 = arith.mulf %88, %97 : vector<8x32xf32>
    %99 = vector.broadcast %3 : vector<1x32xf32> to vector<8x32xf32>
    %100 = arith.mulf %98, %99 : vector<8x32xf32>
    %101 = vector.broadcast %4 : vector<1x32xf32> to vector<8x32xf32>
    %102 = arith.addf %100, %101 : vector<8x32xf32>
    %103 = arith.addf %0, %102 : vector<8x32xf32>
    %c0_56 = arith.constant 0 : index
    %c0_57 = arith.constant 0 : index
    %104 = vector.load %arg5[%c0_56, %c0_57] : memref<32x64xf32, #tpu.memory_space<vmem>>, vector<32x64xf32>
    %cst_58 = arith.constant dense<0.000000e+00> : vector<8x64xf32>
    %105 = tpu.matmul %103, %104, %cst_58 {dimension_numbers = #tpu.dot_dimension_numbers<[1], [0], [0], [1], [0, 0, 1, 1], [], []>} : vector<8x32xf32>, vector<32x64xf32>, vector<8x64xf32> -> vector<8x64xf32>
    %c0_59 = arith.constant 0 : index
    %c0_60 = arith.constant 0 : index
    %106 = vector.load %arg6[%c0_59, %c0_60] : memref<1x64xf32, #tpu.memory_space<vmem>>, vector<1x64xf32>
    %107 = vector.broadcast %106 : vector<1x64xf32> to vector<8x64xf32>
    %108 = arith.addf %105, %107 : vector<8x64xf32>
    %cst_61 = arith.constant 0.000000e+00 : f32
    %109 = vector.broadcast %cst_61 : f32 to vector<8x64xf32>
    %110 = arith.maximumf %108, %109 : vector<8x64xf32>
    %c0_62 = arith.constant 0 : index
    %c0_63 = arith.constant 0 : index
    %111 = vector.load %arg7[%c0_62, %c0_63] : memref<64x32xf32, #tpu.memory_space<vmem>>, vector<64x32xf32>
    %cst_64 = arith.constant dense<0.000000e+00> : vector<8x32xf32>
    %112 = tpu.matmul %110, %111, %cst_64 {dimension_numbers = #tpu.dot_dimension_numbers<[1], [0], [0], [1], [0, 0, 1, 1], [], []>} : vector<8x64xf32>, vector<64x32xf32>, vector<8x32xf32> -> vector<8x32xf32>
    %113 = vector.broadcast %5 : vector<1x32xf32> to vector<8x32xf32>
    %114 = arith.addf %112, %113 : vector<8x32xf32>
    %cst_65 = arith.constant dense<0.000000e+00> : vector<8xf32>
    %115 = vector.multi_reduction <add>, %114, %cst_65 [1] : vector<8x32xf32> to vector<8xf32>
    %116 = vector.shape_cast %115 : vector<8xf32> to vector<8x1xf32>
    %cst_66 = arith.constant 3.200000e+01 : f32
    %117 = vector.broadcast %cst_66 : f32 to vector<8x1xf32>
    %118 = arith.divf %116, %117 : vector<8x1xf32>
    %119 = vector.broadcast %118 : vector<8x1xf32> to vector<8x32xf32>
    %120 = arith.subf %114, %119 : vector<8x32xf32>
    %121 = arith.mulf %120, %120 : vector<8x32xf32>
    %cst_67 = arith.constant dense<0.000000e+00> : vector<8xf32>
    %122 = vector.multi_reduction <add>, %121, %cst_67 [1] : vector<8x32xf32> to vector<8xf32>
    %123 = vector.shape_cast %122 : vector<8xf32> to vector<8x1xf32>
    %cst_68 = arith.constant 3.200000e+01 : f32
    %124 = vector.broadcast %cst_68 : f32 to vector<8x1xf32>
    %125 = arith.divf %123, %124 : vector<8x1xf32>
    %cst_69 = arith.constant 9.99999974E-6 : f32
    %126 = vector.broadcast %cst_69 : f32 to vector<8x1xf32>
    %127 = arith.addf %125, %126 : vector<8x1xf32>
    %128 = math.rsqrt %127 : vector<8x1xf32>
    %129 = vector.broadcast %128 : vector<8x1xf32> to vector<8x32xf32>
    %130 = arith.mulf %120, %129 : vector<8x32xf32>
    %131 = vector.broadcast %6 : vector<1x32xf32> to vector<8x32xf32>
    %132 = arith.mulf %130, %131 : vector<8x32xf32>
    %133 = vector.broadcast %7 : vector<1x32xf32> to vector<8x32xf32>
    %134 = arith.addf %132, %133 : vector<8x32xf32>
    %135 = arith.addf %103, %134 : vector<8x32xf32>
    %c0_70 = arith.constant 0 : index
    %c0_71 = arith.constant 0 : index
    %136 = vector.load %arg9[%c0_70, %c0_71] : memref<8x32xf32, #tpu.memory_space<vmem>>, vector<8x32xf32>
    tpu.vector_store %arg9[%c0_70, %c0_71], %135 {strides = array<i32>} : memref<8x32xf32, #tpu.memory_space<vmem>>, vector<8x32xf32>,
    return
  }
  func.func @transform_0(%arg0: i32) -> (i32, i32) {
    %c0_i32 = arith.constant 0 : i32
    %c0_i32_0 = arith.constant 0 : i32
    return %arg0, %c0_i32 : i32, i32
  }
  func.func @transform_1(%arg0: i32) -> (i32, i32) {
    %c0_i32 = arith.constant 0 : i32
    %c0_i32_0 = arith.constant 0 : i32
    %c0_i32_1 = arith.constant 0 : i32
    return %c0_i32, %c0_i32_0 : i32, i32
  }
  func.func @transform_2(%arg0: i32) -> (i32, i32) {
    %c0_i32 = arith.constant 0 : i32
    %c0_i32_0 = arith.constant 0 : i32
    %c0_i32_1 = arith.constant 0 : i32
    return %c0_i32, %c0_i32_0 : i32, i32
  }
  func.func @transform_3(%arg0: i32) -> (i32, i32) {
    %c0_i32 = arith.constant 0 : i32
    %c0_i32_0 = arith.constant 0 : i32
    %c0_i32_1 = arith.constant 0 : i32
    return %c0_i32, %c0_i32_0 : i32, i32
  }
  func.func @transform_4(%arg0: i32) -> (i32, i32) {
    %c0_i32 = arith.constant 0 : i32
    %c0_i32_0 = arith.constant 0 : i32
    %c0_i32_1 = arith.constant 0 : i32
    return %c0_i32, %c0_i32_0 : i32, i32
  }
  func.func @transform_5(%arg0: i32) -> (i32, i32) {
    %c0_i32 = arith.constant 0 : i32
    %c0_i32_0 = arith.constant 0 : i32
    %c0_i32_1 = arith.constant 0 : i32
    return %c0_i32, %c0_i32_0 : i32, i32
  }
  func.func @transform_6(%arg0: i32) -> (i32, i32) {
    %c0_i32 = arith.constant 0 : i32
    %c0_i32_0 = arith.constant 0 : i32
    %c0_i32_1 = arith.constant 0 : i32
    return %c0_i32, %c0_i32_0 : i32, i32
  }
  func.func @transform_7(%arg0: i32) -> (i32, i32) {
    %c0_i32 = arith.constant 0 : i32
    %c0_i32_0 = arith.constant 0 : i32
    %c0_i32_1 = arith.constant 0 : i32
    return %c0_i32, %c0_i32_0 : i32, i32
  }
  func.func @transform_8(%arg0: i32) -> (i32, i32) {
    %c0_i32 = arith.constant 0 : i32
    %c0_i32_0 = arith.constant 0 : i32
    return %arg0, %c0_i32 : i32, i32
  }
}

module attributes {stable_mosaic.version = 11 : i64} {
  func.func @encoder_layer_kernel(%arg0: i32, %arg1: memref<8x32xf32, #tpu.memory_space<vmem>>, %arg2: memref<32x96xf32, #tpu.memory_space<vmem>>, %arg3: memref<1x96xf32, #tpu.memory_space<vmem>>, %arg4: memref<32x32xf32, #tpu.memory_space<vmem>>, %arg5: memref<32x64xf32, #tpu.memory_space<vmem>>, %arg6: memref<1x64xf32, #tpu.memory_space<vmem>>, %arg7: memref<64x32xf32, #tpu.memory_space<vmem>>, %arg8: memref<6x32xf32, #tpu.memory_space<vmem>>, %arg9: memref<8x32xf32, #tpu.memory_space<vmem>>, %arg10: memref<8x96xf32, #tpu.memory_space<vmem>>, %arg11: memref<8x32xf32, #tpu.memory_space<vmem>>) attributes {dimension_semantics = [#tpu.dimension_semantics<parallel>], iteration_bounds = array<i64: 2>, scalar_prefetch = 0 : i64, scratch_operands = 2 : i64, tpu.core_type = #tpu.core_type<tc>, window_params = [{transform_indices = @transform_0, window_bounds = array<i64: 8, 32>}, {pipeline_mode = #tpu.pipeline_mode<synchronous>, transform_indices = @transform_1, window_bounds = array<i64: 32, 96>}, {pipeline_mode = #tpu.pipeline_mode<synchronous>, transform_indices = @transform_2, window_bounds = array<i64: 1, 96>}, {pipeline_mode = #tpu.pipeline_mode<synchronous>, transform_indices = @transform_3, window_bounds = array<i64: 32, 32>}, {pipeline_mode = #tpu.pipeline_mode<synchronous>, transform_indices = @transform_4, window_bounds = array<i64: 32, 64>}, {pipeline_mode = #tpu.pipeline_mode<synchronous>, transform_indices = @transform_5, window_bounds = array<i64: 1, 64>}, {pipeline_mode = #tpu.pipeline_mode<synchronous>, transform_indices = @transform_6, window_bounds = array<i64: 64, 32>}, {pipeline_mode = #tpu.pipeline_mode<synchronous>, transform_indices = @transform_7, window_bounds = array<i64: 6, 32>}, {transform_indices = @transform_8, window_bounds = array<i64: 8, 32>}]} {
    %c0 = arith.constant 0 : index
    %c0_0 = arith.constant 0 : index
    %0 = vector.load %arg1[%c0, %c0_0] : memref<8x32xf32, #tpu.memory_space<vmem>>, vector<8x32xf32>
    %c0_1 = arith.constant 0 : index
    %c0_2 = arith.constant 0 : index
    %1 = vector.load %arg8[%c0_1, %c0_2] : memref<6x32xf32, #tpu.memory_space<vmem>>, vector<6x32xf32>
    %2 = vector.extract_strided_slice %1 {offsets = [0, 0], sizes = [1, 32], strides = [1, 1]} : vector<6x32xf32> to vector<1x32xf32>
    %3 = vector.extract_strided_slice %1 {offsets = [1, 0], sizes = [1, 32], strides = [1, 1]} : vector<6x32xf32> to vector<1x32xf32>
    %4 = vector.extract_strided_slice %1 {offsets = [2, 0], sizes = [1, 32], strides = [1, 1]} : vector<6x32xf32> to vector<1x32xf32>
    %5 = vector.extract_strided_slice %1 {offsets = [3, 0], sizes = [1, 32], strides = [1, 1]} : vector<6x32xf32> to vector<1x32xf32>
    %6 = vector.extract_strided_slice %1 {offsets = [4, 0], sizes = [1, 32], strides = [1, 1]} : vector<6x32xf32> to vector<1x32xf32>
    %7 = vector.extract_strided_slice %1 {offsets = [5, 0], sizes = [1, 32], strides = [1, 1]} : vector<6x32xf32> to vector<1x32xf32>
    %c0_3 = arith.constant 0 : index
    %c0_4 = arith.constant 0 : index
    %8 = vector.load %arg2[%c0_3, %c0_4] : memref<32x96xf32, #tpu.memory_space<vmem>>, vector<32x96xf32>
    %cst = arith.constant dense<0.000000e+00> : vector<8x96xf32>
    %9 = tpu.matmul %0, %8, %cst {dimension_numbers = #tpu.dot_dimension_numbers<[1], [0], [0], [1], [0, 0, 1, 1], [], []>} : vector<8x32xf32>, vector<32x96xf32>, vector<8x96xf32> -> vector<8x96xf32>
    %c0_5 = arith.constant 0 : index
    %c0_6 = arith.constant 0 : index
    %10 = vector.load %arg3[%c0_5, %c0_6] : memref<1x96xf32, #tpu.memory_space<vmem>>, vector<1x96xf32>
    %11 = vector.broadcast %10 : vector<1x96xf32> to vector<8x96xf32>
    %12 = arith.addf %9, %11 : vector<8x96xf32>
    %c0_7 = arith.constant 0 : index
    %c0_8 = arith.constant 0 : index
    %13 = vector.load %arg10[%c0_7, %c0_8] : memref<8x96xf32, #tpu.memory_space<vmem>>, vector<8x96xf32>
    tpu.vector_store %arg10[%c0_7, %c0_8], %12 {strides = array<i32>} : memref<8x96xf32, #tpu.memory_space<vmem>>, vector<8x96xf32>,
    %c0_9 = arith.constant 0 : index
    %c0_10 = arith.constant 0 : index
    %14 = vector.load %arg10[%c0_9, %c0_10] : memref<8x96xf32, #tpu.memory_space<vmem>>, vector<8x8xf32>
    %c0_11 = arith.constant 0 : index
    %c32 = arith.constant 32 : index
    %15 = vector.load %arg10[%c0_11, %c32] : memref<8x96xf32, #tpu.memory_space<vmem>>, vector<8x8xf32>
    %c0_12 = arith.constant 0 : index
    %c64 = arith.constant 64 : index
    %16 = vector.load %arg10[%c0_12, %c64] : memref<8x96xf32, #tpu.memory_space<vmem>>, vector<8x8xf32>
    "tpu.trace_start"() <{level = 10 : i32, message = "td,sd->ts"}> : () -> ()
    %cst_13 = arith.constant dense<0.000000e+00> : vector<8x8xf32>
    %17 = tpu.matmul %14, %15, %cst_13 {dimension_numbers = #tpu.dot_dimension_numbers<[1], [1], [0], [0], [0, 0, 1, 0], [], []>} : vector<8x8xf32>, vector<8x8xf32>, vector<8x8xf32> -> vector<8x8xf32>
    "tpu.trace_stop"() : () -> ()
    %cst_14 = arith.constant dense<0xFF800000> : vector<8xf32>
    %18 = vector.multi_reduction <maximumf>, %17, %cst_14 [1] : vector<8x8xf32> to vector<8xf32>
    %19 = vector.shape_cast %18 : vector<8xf32> to vector<8x1xf32>
    %20 = vector.broadcast %19 : vector<8x1xf32> to vector<8x8xf32>
    %21 = arith.subf %17, %20 : vector<8x8xf32>
    %22 = math.exp %21 : vector<8x8xf32>
    %cst_15 = arith.constant dense<0.000000e+00> : vector<8xf32>
    %23 = vector.multi_reduction <add>, %22, %cst_15 [1] : vector<8x8xf32> to vector<8xf32>
    %24 = vector.shape_cast %23 : vector<8xf32> to vector<8x1xf32>
    %25 = tpu.reciprocal %24 {approx = true} : vector<8x1xf32> -> vector<8x1xf32>
    %26 = vector.broadcast %25 : vector<8x1xf32> to vector<8x8xf32>
    %27 = arith.mulf %22, %26 : vector<8x8xf32>
    %cst_16 = arith.constant dense<0.000000e+00> : vector<8x8xf32>
    %28 = tpu.matmul %27, %16, %cst_16 {dimension_numbers = #tpu.dot_dimension_numbers<[1], [0], [0], [1], [0, 0, 1, 1], [], []>} : vector<8x8xf32>, vector<8x8xf32>, vector<8x8xf32> -> vector<8x8xf32>
    %c0_17 = arith.constant 0 : index
    %c0_18 = arith.constant 0 : index
    %29 = vector.load %arg11[%c0_17, %c0_18] : memref<8x32xf32, #tpu.memory_space<vmem>>, vector<8x8xf32>
    tpu.vector_store %arg11[%c0_17, %c0_18], %28 {strides = array<i32>} : memref<8x32xf32, #tpu.memory_space<vmem>>, vector<8x8xf32>,
    %c0_19 = arith.constant 0 : index
    %c8 = arith.constant 8 : index
    %30 = vector.load %arg10[%c0_19, %c8] : memref<8x96xf32, #tpu.memory_space<vmem>>, vector<8x8xf32>
    %c0_20 = arith.constant 0 : index
    %c40 = arith.constant 40 : index
    %31 = vector.load %arg10[%c0_20, %c40] : memref<8x96xf32, #tpu.memory_space<vmem>>, vector<8x8xf32>
    %c0_21 = arith.constant 0 : index
    %c72 = arith.constant 72 : index
    %32 = vector.load %arg10[%c0_21, %c72] : memref<8x96xf32, #tpu.memory_space<vmem>>, vector<8x8xf32>
    "tpu.trace_start"() <{level = 10 : i32, message = "td,sd->ts"}> : () -> ()
    %cst_22 = arith.constant dense<0.000000e+00> : vector<8x8xf32>
    %33 = tpu.matmul %30, %31, %cst_22 {dimension_numbers = #tpu.dot_dimension_numbers<[1], [1], [0], [0], [0, 0, 1, 0], [], []>} : vector<8x8xf32>, vector<8x8xf32>, vector<8x8xf32> -> vector<8x8xf32>
    "tpu.trace_stop"() : () -> ()
    %cst_23 = arith.constant dense<0xFF800000> : vector<8xf32>
    %34 = vector.multi_reduction <maximumf>, %33, %cst_23 [1] : vector<8x8xf32> to vector<8xf32>
    %35 = vector.shape_cast %34 : vector<8xf32> to vector<8x1xf32>
    %36 = vector.broadcast %35 : vector<8x1xf32> to vector<8x8xf32>
    %37 = arith.subf %33, %36 : vector<8x8xf32>
    %38 = math.exp %37 : vector<8x8xf32>
    %cst_24 = arith.constant dense<0.000000e+00> : vector<8xf32>
    %39 = vector.multi_reduction <add>, %38, %cst_24 [1] : vector<8x8xf32> to vector<8xf32>
    %40 = vector.shape_cast %39 : vector<8xf32> to vector<8x1xf32>
    %41 = tpu.reciprocal %40 {approx = true} : vector<8x1xf32> -> vector<8x1xf32>
    %42 = vector.broadcast %41 : vector<8x1xf32> to vector<8x8xf32>
    %43 = arith.mulf %38, %42 : vector<8x8xf32>
    %cst_25 = arith.constant dense<0.000000e+00> : vector<8x8xf32>
    %44 = tpu.matmul %43, %32, %cst_25 {dimension_numbers = #tpu.dot_dimension_numbers<[1], [0], [0], [1], [0, 0, 1, 1], [], []>} : vector<8x8xf32>, vector<8x8xf32>, vector<8x8xf32> -> vector<8x8xf32>
    %c0_26 = arith.constant 0 : index
    %c8_27 = arith.constant 8 : index
    %45 = vector.load %arg11[%c0_26, %c8_27] : memref<8x32xf32, #tpu.memory_space<vmem>>, vector<8x8xf32>
    tpu.vector_store %arg11[%c0_26, %c8_27], %44 {strides = array<i32>} : memref<8x32xf32, #tpu.memory_space<vmem>>, vector<8x8xf32>,
    %c0_28 = arith.constant 0 : index
    %c16 = arith.constant 16 : index
    %46 = vector.load %arg10[%c0_28, %c16] : memref<8x96xf32, #tpu.memory_space<vmem>>, vector<8x8xf32>
    %c0_29 = arith.constant 0 : index
    %c48 = arith.constant 48 : index
    %47 = vector.load %arg10[%c0_29, %c48] : memref<8x96xf32, #tpu.memory_space<vmem>>, vector<8x8xf32>
    %c0_30 = arith.constant 0 : index
    %c80 = arith.constant 80 : index
    %48 = vector.load %arg10[%c0_30, %c80] : memref<8x96xf32, #tpu.memory_space<vmem>>, vector<8x8xf32>
    "tpu.trace_start"() <{level = 10 : i32, message = "td,sd->ts"}> : () -> ()
    %cst_31 = arith.constant dense<0.000000e+00> : vector<8x8xf32>
    %49 = tpu.matmul %46, %47, %cst_31 {dimension_numbers = #tpu.dot_dimension_numbers<[1], [1], [0], [0], [0, 0, 1, 0], [], []>} : vector<8x8xf32>, vector<8x8xf32>, vector<8x8xf32> -> vector<8x8xf32>
    "tpu.trace_stop"() : () -> ()
    %cst_32 = arith.constant dense<0xFF800000> : vector<8xf32>
    %50 = vector.multi_reduction <maximumf>, %49, %cst_32 [1] : vector<8x8xf32> to vector<8xf32>
    %51 = vector.shape_cast %50 : vector<8xf32> to vector<8x1xf32>
    %52 = vector.broadcast %51 : vector<8x1xf32> to vector<8x8xf32>
    %53 = arith.subf %49, %52 : vector<8x8xf32>
    %54 = math.exp %53 : vector<8x8xf32>
    %cst_33 = arith.constant dense<0.000000e+00> : vector<8xf32>
    %55 = vector.multi_reduction <add>, %54, %cst_33 [1] : vector<8x8xf32> to vector<8xf32>
    %56 = vector.shape_cast %55 : vector<8xf32> to vector<8x1xf32>
    %57 = tpu.reciprocal %56 {approx = true} : vector<8x1xf32> -> vector<8x1xf32>
    %58 = vector.broadcast %57 : vector<8x1xf32> to vector<8x8xf32>
    %59 = arith.mulf %54, %58 : vector<8x8xf32>
    %cst_34 = arith.constant dense<0.000000e+00> : vector<8x8xf32>
    %60 = tpu.matmul %59, %48, %cst_34 {dimension_numbers = #tpu.dot_dimension_numbers<[1], [0], [0], [1], [0, 0, 1, 1], [], []>} : vector<8x8xf32>, vector<8x8xf32>, vector<8x8xf32> -> vector<8x8xf32>
    %c0_35 = arith.constant 0 : index
    %c16_36 = arith.constant 16 : index
    %61 = vector.load %arg11[%c0_35, %c16_36] : memref<8x32xf32, #tpu.memory_space<vmem>>, vector<8x8xf32>
    tpu.vector_store %arg11[%c0_35, %c16_36], %60 {strides = array<i32>} : memref<8x32xf32, #tpu.memory_space<vmem>>, vector<8x8xf32>,
    %c0_37 = arith.constant 0 : index
    %c24 = arith.constant 24 : index
    %62 = vector.load %arg10[%c0_37, %c24] : memref<8x96xf32, #tpu.memory_space<vmem>>, vector<8x8xf32>
    %c0_38 = arith.constant 0 : index
    %c56 = arith.constant 56 : index
    %63 = vector.load %arg10[%c0_38, %c56] : memref<8x96xf32, #tpu.memory_space<vmem>>, vector<8x8xf32>
    %c0_39 = arith.constant 0 : index
    %c88 = arith.constant 88 : index
    %64 = vector.load %arg10[%c0_39, %c88] : memref<8x96xf32, #tpu.memory_space<vmem>>, vector<8x8xf32>
    "tpu.trace_start"() <{level = 10 : i32, message = "td,sd->ts"}> : () -> ()
    %cst_40 = arith.constant dense<0.000000e+00> : vector<8x8xf32>
    %65 = tpu.matmul %62, %63, %cst_40 {dimension_numbers = #tpu.dot_dimension_numbers<[1], [1], [0], [0], [0, 0, 1, 0], [], []>} : vector<8x8xf32>, vector<8x8xf32>, vector<8x8xf32> -> vector<8x8xf32>
    "tpu.trace_stop"() : () -> ()
    %cst_41 = arith.constant dense<0xFF800000> : vector<8xf32>
    %66 = vector.multi_reduction <maximumf>, %65, %cst_41 [1] : vector<8x8xf32> to vector<8xf32>
    %67 = vector.shape_cast %66 : vector<8xf32> to vector<8x1xf32>
    %68 = vector.broadcast %67 : vector<8x1xf32> to vector<8x8xf32>
    %69 = arith.subf %65, %68 : vector<8x8xf32>
    %70 = math.exp %69 : vector<8x8xf32>
    %cst_42 = arith.constant dense<0.000000e+00> : vector<8xf32>
    %71 = vector.multi_reduction <add>, %70, %cst_42 [1] : vector<8x8xf32> to vector<8xf32>
    %72 = vector.shape_cast %71 : vector<8xf32> to vector<8x1xf32>
    %73 = tpu.reciprocal %72 {approx = true} : vector<8x1xf32> -> vector<8x1xf32>
    %74 = vector.broadcast %73 : vector<8x1xf32> to vector<8x8xf32>
    %75 = arith.mulf %70, %74 : vector<8x8xf32>
    %cst_43 = arith.constant dense<0.000000e+00> : vector<8x8xf32>
    %76 = tpu.matmul %75, %64, %cst_43 {dimension_numbers = #tpu.dot_dimension_numbers<[1], [0], [0], [1], [0, 0, 1, 1], [], []>} : vector<8x8xf32>, vector<8x8xf32>, vector<8x8xf32> -> vector<8x8xf32>
    %c0_44 = arith.constant 0 : index
    %c24_45 = arith.constant 24 : index
    %77 = vector.load %arg11[%c0_44, %c24_45] : memref<8x32xf32, #tpu.memory_space<vmem>>, vector<8x8xf32>
    tpu.vector_store %arg11[%c0_44, %c24_45], %76 {strides = array<i32>} : memref<8x32xf32, #tpu.memory_space<vmem>>, vector<8x8xf32>,
    %c0_46 = arith.constant 0 : index
    %c0_47 = arith.constant 0 : index
    %78 = vector.load %arg11[%c0_46, %c0_47] : memref<8x32xf32, #tpu.memory_space<vmem>>, vector<8x32xf32>
    %c0_48 = arith.constant 0 : index
    %c0_49 = arith.constant 0 : index
    %79 = vector.load %arg4[%c0_48, %c0_49] : memref<32x32xf32, #tpu.memory_space<vmem>>, vector<32x32xf32>
    %cst_50 = arith.constant dense<0.000000e+00> : vector<8x32xf32>
    %80 = tpu.matmul %78, %79, %cst_50 {dimension_numbers = #tpu.dot_dimension_numbers<[1], [0], [0], [1], [0, 0, 1, 1], [], []>} : vector<8x32xf32>, vector<32x32xf32>, vector<8x32xf32> -> vector<8x32xf32>
    %81 = vector.broadcast %2 : vector<1x32xf32> to vector<8x32xf32>
    %82 = arith.addf %80, %81 : vector<8x32xf32>
    %cst_51 = arith.constant dense<0.000000e+00> : vector<8xf32>
    %83 = vector.multi_reduction <add>, %82, %cst_51 [1] : vector<8x32xf32> to vector<8xf32>
    %84 = vector.shape_cast %83 : vector<8xf32> to vector<8x1xf32>
    %cst_52 = arith.constant 3.200000e+01 : f32
    %85 = vector.broadcast %cst_52 : f32 to vector<8x1xf32>
    %86 = arith.divf %84, %85 : vector<8x1xf32>
    %87 = vector.broadcast %86 : vector<8x1xf32> to vector<8x32xf32>
    %88 = arith.subf %82, %87 : vector<8x32xf32>
    %89 = arith.mulf %88, %88 : vector<8x32xf32>
    %cst_53 = arith.constant dense<0.000000e+00> : vector<8xf32>
    %90 = vector.multi_reduction <add>, %89, %cst_53 [1] : vector<8x32xf32> to vector<8xf32>
    %91 = vector.shape_cast %90 : vector<8xf32> to vector<8x1xf32>
    %cst_54 = arith.constant 3.200000e+01 : f32
    %92 = vector.broadcast %cst_54 : f32 to vector<8x1xf32>
    %93 = arith.divf %91, %92 : vector<8x1xf32>
    %cst_55 = arith.constant 9.99999974E-6 : f32
    %94 = vector.broadcast %cst_55 : f32 to vector<8x1xf32>
    %95 = arith.addf %93, %94 : vector<8x1xf32>
    %96 = math.rsqrt %95 : vector<8x1xf32>
    %97 = vector.broadcast %96 : vector<8x1xf32> to vector<8x32xf32>
    %98 = arith.mulf %88, %97 : vector<8x32xf32>
    %99 = vector.broadcast %3 : vector<1x32xf32> to vector<8x32xf32>
    %100 = arith.mulf %98, %99 : vector<8x32xf32>
    %101 = vector.broadcast %4 : vector<1x32xf32> to vector<8x32xf32>
    %102 = arith.addf %100, %101 : vector<8x32xf32>
    %103 = arith.addf %0, %102 : vector<8x32xf32>
    %c0_56 = arith.constant 0 : index
    %c0_57 = arith.constant 0 : index
    %104 = vector.load %arg5[%c0_56, %c0_57] : memref<32x64xf32, #tpu.memory_space<vmem>>, vector<32x64xf32>
    %cst_58 = arith.constant dense<0.000000e+00> : vector<8x64xf32>
    %105 = tpu.matmul %103, %104, %cst_58 {dimension_numbers = #tpu.dot_dimension_numbers<[1], [0], [0], [1], [0, 0, 1, 1], [], []>} : vector<8x32xf32>, vector<32x64xf32>, vector<8x64xf32> -> vector<8x64xf32>
    %c0_59 = arith.constant 0 : index
    %c0_60 = arith.constant 0 : index
    %106 = vector.load %arg6[%c0_59, %c0_60] : memref<1x64xf32, #tpu.memory_space<vmem>>, vector<1x64xf32>
    %107 = vector.broadcast %106 : vector<1x64xf32> to vector<8x64xf32>
    %108 = arith.addf %105, %107 : vector<8x64xf32>
    %cst_61 = arith.constant 0.000000e+00 : f32
    %109 = vector.broadcast %cst_61 : f32 to vector<8x64xf32>
    %110 = arith.maximumf %108, %109 : vector<8x64xf32>
    %c0_62 = arith.constant 0 : index
    %c0_63 = arith.constant 0 : index
    %111 = vector.load %arg7[%c0_62, %c0_63] : memref<64x32xf32, #tpu.memory_space<vmem>>, vector<64x32xf32>
    %cst_64 = arith.constant dense<0.000000e+00> : vector<8x32xf32>
    %112 = tpu.matmul %110, %111, %cst_64 {dimension_numbers = #tpu.dot_dimension_numbers<[1], [0], [0], [1], [0, 0, 1, 1], [], []>} : vector<8x64xf32>, vector<64x32xf32>, vector<8x32xf32> -> vector<8x32xf32>
    %113 = vector.broadcast %5 : vector<1x32xf32> to vector<8x32xf32>
    %114 = arith.addf %112, %113 : vector<8x32xf32>
    %cst_65 = arith.constant dense<0.000000e+00> : vector<8xf32>
    %115 = vector.multi_reduction <add>, %114, %cst_65 [1] : vector<8x32xf32> to vector<8xf32>
    %116 = vector.shape_cast %115 : vector<8xf32> to vector<8x1xf32>
    %cst_66 = arith.constant 3.200000e+01 : f32
    %117 = vector.broadcast %cst_66 : f32 to vector<8x1xf32>
    %118 = arith.divf %116, %117 : vector<8x1xf32>
    %119 = vector.broadcast %118 : vector<8x1xf32> to vector<8x32xf32>
    %120 = arith.subf %114, %119 : vector<8x32xf32>
    %121 = arith.mulf %120, %120 : vector<8x32xf32>
    %cst_67 = arith.constant dense<0.000000e+00> : vector<8xf32>
    %122 = vector.multi_reduction <add>, %121, %cst_67 [1] : vector<8x32xf32> to vector<8xf32>
    %123 = vector.shape_cast %122 : vector<8xf32> to vector<8x1xf32>
    %cst_68 = arith.constant 3.200000e+01 : f32
    %124 = vector.broadcast %cst_68 : f32 to vector<8x1xf32>
    %125 = arith.divf %123, %124 : vector<8x1xf32>
    %cst_69 = arith.constant 9.99999974E-6 : f32
    %126 = vector.broadcast %cst_69 : f32 to vector<8x1xf32>
    %127 = arith.addf %125, %126 : vector<8x1xf32>
    %128 = math.rsqrt %127 : vector<8x1xf32>
    %129 = vector.broadcast %128 : vector<8x1xf32> to vector<8x32xf32>
    %130 = arith.mulf %120, %129 : vector<8x32xf32>
    %131 = vector.broadcast %6 : vector<1x32xf32> to vector<8x32xf32>
    %132 = arith.mulf %130, %131 : vector<8x32xf32>
    %133 = vector.broadcast %7 : vector<1x32xf32> to vector<8x32xf32>
    %134 = arith.addf %132, %133 : vector<8x32xf32>
    %135 = arith.addf %103, %134 : vector<8x32xf32>
    %c0_70 = arith.constant 0 : index
    %c0_71 = arith.constant 0 : index
    %136 = vector.load %arg9[%c0_70, %c0_71] : memref<8x32xf32, #tpu.memory_space<vmem>>, vector<8x32xf32>
    tpu.vector_store %arg9[%c0_70, %c0_71], %135 {strides = array<i32>} : memref<8x32xf32, #tpu.memory_space<vmem>>, vector<8x32xf32>,
    return
  }
  func.func @transform_0(%arg0: i32) -> (i32, i32) {
    %c0_i32 = arith.constant 0 : i32
    %c0_i32_0 = arith.constant 0 : i32
    return %arg0, %c0_i32 : i32, i32
  }
  func.func @transform_1(%arg0: i32) -> (i32, i32) {
    %c0_i32 = arith.constant 0 : i32
    %c0_i32_0 = arith.constant 0 : i32
    %c0_i32_1 = arith.constant 0 : i32
    return %c0_i32, %c0_i32_0 : i32, i32
  }
  func.func @transform_2(%arg0: i32) -> (i32, i32) {
    %c0_i32 = arith.constant 0 : i32
    %c0_i32_0 = arith.constant 0 : i32
    %c0_i32_1 = arith.constant 0 : i32
    return %c0_i32, %c0_i32_0 : i32, i32
  }
  func.func @transform_3(%arg0: i32) -> (i32, i32) {
    %c0_i32 = arith.constant 0 : i32
    %c0_i32_0 = arith.constant 0 : i32
    %c0_i32_1 = arith.constant 0 : i32
    return %c0_i32, %c0_i32_0 : i32, i32
  }
  func.func @transform_4(%arg0: i32) -> (i32, i32) {
    %c0_i32 = arith.constant 0 : i32
    %c0_i32_0 = arith.constant 0 : i32
    %c0_i32_1 = arith.constant 0 : i32
    return %c0_i32, %c0_i32_0 : i32, i32
  }
  func.func @transform_5(%arg0: i32) -> (i32, i32) {
    %c0_i32 = arith.constant 0 : i32
    %c0_i32_0 = arith.constant 0 : i32
    %c0_i32_1 = arith.constant 0 : i32
    return %c0_i32, %c0_i32_0 : i32, i32
  }
  func.func @transform_6(%arg0: i32) -> (i32, i32) {
    %c0_i32 = arith.constant 0 : i32
    %c0_i32_0 = arith.constant 0 : i32
    %c0_i32_1 = arith.constant 0 : i32
    return %c0_i32, %c0_i32_0 : i32, i32
  }
  func.func @transform_7(%arg0: i32) -> (i32, i32) {
    %c0_i32 = arith.constant 0 : i32
    %c0_i32_0 = arith.constant 0 : i32
    %c0_i32_1 = arith.constant 0 : i32
    return %c0_i32, %c0_i32_0 : i32, i32
  }
  func.func @transform_8(%arg0: i32) -> (i32, i32) {
    %c0_i32 = arith.constant 0 : i32
    %c0_i32_0 = arith.constant 0 : i32
    return %arg0, %c0_i32 : i32, i32
  }
}

</mosaic_0001>

<bundles_post_ra>
// kernel: tpu_custom_call.1
= control target key start
LH: loop header
LB: loop body
LE: loop exit
PB: predicated region body
PF: predicated region fallthrough
CT: control target
= control target key end

     0   :  { %s1500_s0 = inlined_call_operand.hbm [shape: f32[16,32], index: 0, kind: input, shape index: {}]   ;;  %s1501_s1 = inlined_call_operand.vmem [shape: f32[32,96], index: 1, kind: input, shape index: {}]   ;;  %s1502_s2 = inlined_call_operand.vmem [shape: f32[1,96], index: 2, kind: input, shape index: {}]   ;;  %s1503_s3 = inlined_call_operand.vmem [shape: f32[32,32], index: 3, kind: input, shape index: {}]   ;;  %s1504_s4 = inlined_call_operand.vmem [shape: f32[32,64], index: 4, kind: input, shape index: {}]   ;;  %s1505_s5 = inlined_call_operand.vmem [shape: f32[1,64], index: 5, kind: input, shape index: {}]   ;;  %s1506_s6 = inlined_call_operand.vmem [shape: f32[64,32], index: 6, kind: input, shape index: {}]   ;;  %s1507_s7 = inlined_call_operand.hbm [shape: f32[6,32], index: 7, kind: input, shape index: {}]   ;;  %s1508_s8 = inlined_call_operand.hbm [shape: f32[16,32], index: 8, kind: output, shape index: {}]  }
   0x1   :  { %1509 = sst [smem:[#allocation14_spill]] %s1507_s7 }
   0x2   :  { %13 = vsyncpa [#allocation5], 0 }
   0x3   :  { %15 = vsyncpa [#allocation5 + $0x1], 0 }
   0x4   :  { %16 = vsyncpa [#allocation8], 0 }
   0x5   :  { %17 = vsyncpa [#allocation6], 0 }
   0x6   :  { %19 = vsyncpa [#allocation6 + $0x1], 0  ;;  %s1231_s27 = smov 0   ;;  %s1233_s28 = smov 0  }
   0x7   :  { %s1235_s29 = smov 0   ;;  %s1237_s30 = smov 0  }
   0x8 LB: > { %s1252_s9 = sadd.s32 4294967295, %s1168_s30   ;;  %s912_s10 = sadd.s32 4294967294, %s1168_s30   ;;  %s1168_s30 = sphi %s1237_s30, %s1522_s30   ;;  %s1164_s29 = sphi %s1235_s29, %s1521_s29   ;;  %s1160_s28 = sphi %s1233_s28, %s1520_s28   ;;  %s1156_s27 = sphi %s1231_s27, %s1519_s27  }
   0x9   : > { %p45_p0 = scmp.ne.s32.totalorder %s1160_s28, %s1156_s27  ;;  %p46_p1 = scmp.eq.s32.totalorder %s1252_s9, 0 }
   0xa   : > { %p216_p2 = scmp.eq.s32.totalorder %s1252_s9, 1  ;;  %p222_p3 = scmp.eq.s32.totalorder %s912_s10, 1 }
   0xb   : > { %p1261_p4 = por %p46_p1, %p45_p0  ;;  %p913_p5 = scmp.ge.s32.totalorder %s1168_s30, 1 }
   0xc   : > { %p1266_p6 = por %p222_p3, %p45_p0  ;;  %p229_p7 = scmp.lt.s32.totalorder %s1168_s30, 3 }
   0xd   : > { %s1512_s7 = sld [smem:[#allocation14_spill]]  ;;  %s1170_s17 = smov [#allocation7]  }
   0xe   : > { %p1274_p8 = pnand %p913_p5, %p229_p7  ;;  %s261_s18 = sshll.u32 %s1170_s17, 4  ;;  %s262_s18 = int_to_ptr.vmem [resolvable:$true] %s261_s18 }
   0xf   : > { %s1284_s19 = sadd.s32 1, %s1168_s30   ;;  %s32_s20 = sadd.s32 1, %s1164_s29 }
  0x10   : > { %p950_p10 = pneg %p1274_p8  ;;  %s29_s21 = ssub.s32 %s1168_s30, %s1284_s19 }
  0x11   : > { %p30_p12 = scmp.eq.s32.totalorder %s29_s21, 0  ;;  %p39_p13 = scmp.ne.s32.totalorder %s1164_s29, %s1160_s28 }
  0x12   : > { %p951_p11 = pnand %p950_p10, %p46_p1  ;;  %p40_p0 = scmp.eq.s32.totalorder %s1168_s30, 0 }
  0x13   : > { %s259_s15 = sshll.u32 %s1512_s7, 4  ;;  %p1297_p3 = por %p216_p2, %p39_p13  ;;  %s260_s15 = int_to_ptr.hbm [resolvable:$true] %s259_s15 }
  0x14   : > { %953 = dma.hbm_to_vmem [thread:$0]  (!%p951_p11), %s260_s15, 128, %s262_s18, [#allocation8]  }
  0x15   : > { %s1293_s22 = scalar_select %p30_p12, %s1164_s29, %s32_s20  }
  0x16   : > { %p963_p5 = scmp.lt.s32.totalorder %s1168_s30, 2  ;;  %s272_s24 = sand.u32 1, %s1164_s29  }
  0x17   : > { %1514 = sst [smem:[#allocation13_spill]] %s1293_s22  ;;  %s917_s25 = sshll.u32 %s1168_s30, 3 }
  0x18   : > { %p41_p7 = por %p40_p0, %p39_p13  ;;  %s916_s26 = sshll.u32 %s272_s24, 3 }
  0x19   : > { %s280_s14 = scalar_lea.hbm %s1500_s0, %s917_s25  ;;  %s276_s17 = scalar_lea.vmem [#allocation4], %s916_s26 }
  0x1a   : > { %s282_s15 = sshll.u32 %s280_s14, 4  ;;  %s284_s18 = sshll.u32 %s276_s17, 4  ;;  %s283_s15 = int_to_ptr.hbm [resolvable:$true] %s282_s15  ;;  %s285_s18 = int_to_ptr.vmem [resolvable:$true] %s284_s18 }
  0x1b   : > { %p1307_p10 = pnand %p963_p5, %p41_p7  ;;  %s273_s21 = scalar_lea.sflag [#allocation5], %s272_s24 }
  0x1c   : > { %s1068_s7 = sshra.s32 %s283_s15, 4  ;;  %s1075_s26 = scalar_lea.hbm %s1500_s0, 16  ;;  %s1069_s7 = int_to_ptr.hbm [resolvable:$true] %s1068_s7 }
  0x1d   : > { %s1070_s22 = scalar_lea.hbm %s1069_s7, 8  ;;  %p1072_p11 = pneg %p1307_p10 }
  0x1e   : > { %p1071_p2 = scmp.ne.s32.totalorder %s1069_s7, %s1070_s22  ;;  %p1076_p0 = scmp.lt.s32.totalorder %s1069_s7, %s1500_s0 }
  0x1f   : > { %p1077_p5 = scmp.lt.s32.totalorder %s1075_s26, %s1070_s22 }
  0x20   : > { %p1073_p12 = pnand %p1072_p11, %p1071_p2 }
  0x21   : > { %p1078_p7 = por %p1077_p5, %p1076_p0 }
  0x22   : > { %p1074_p13 = pneg %p1073_p12 }
  0x24   : > { %p1079_p9 = pnand %p1078_p7, %p1074_p13 }
  0x26   : > { %1082 = shalt.err (!%p1079_p9)
}
  0x27   : > { %957 = dma.hbm_to_vmem [thread:$0]  (!%p1307_p10), %s283_s15, 128, %s285_s18, %s273_s21  }
  0x28   : > { %293 = sbr.rel (%p1274_p8) target bundleno = 2289 (0x8f1), region = 52  ;;  %s1324_s24 = sand.u32 (!%p1274_p8), 1, %s1160_s28  }
  0x29   : > { %s919_s17 = sshll.u32 (!%p1274_p8), %s1324_s24, 3  ;;  %s296_s25 = scalar_lea.sflag (!%p1274_p8), [#allocation5], %s1324_s24 }
  0x2a   : > { %s299_s7 = scalar_lea.vmem (!%p1274_p8), [#allocation4], %s919_s17 }
  0x2d   : > { %1143 = dma.done.wait (%p1261_p4), %s296_s25, 128  }
  0x2e   : > { %1145 = vsyncadd (%p1261_p4), %s296_s25, 4294967168 }
  0x2f   : > { %1147 = dma.done.wait (%p46_p1), [#allocation8], 128  }
  0x30   : > { %1149 = vsyncadd (%p46_p1), [#allocation8], 4294967168  ;;  %v343_v0 = vld [vmem:[%s1501_s1 + $0x18] sm:$0xff]  ;;  %v342_v1 = vld [vmem:[%s1501_s1 + $0x10] sm:$0xff]  ;;  %vm348_vm0 = vcmask 261120   ;;  %vm372_vm1 = vcmask 785408  }
  0x31   : > { %364 = vmatpush.msra.mxu0 %v343_v0  ;;  %v341_v2 = vld [vmem:[%s1501_s1 + $0x8] sm:$0xff]  ;;  %v340_v3 = vld [vmem:[%s1501_s1] sm:$0xff]  ;;  %v1350_v4 = vld [vmem:[%s299_s7] sm:$0xff]  ;;  %s1171_s14 = smov 120   ;;  %s1172_s25 = smov 64   ;;  %vm378_vm2 = vcmask 64512  }
  0x32   : > { %v1014_v5 = vld [vmem:[%s1502_s2] ss:$0 sm:$0xff]  ;;  %s1173_s7 = smov 96   ;;  %s1174_s16 = smov 56   ;;  %vm512_vm3 = vcmask 130112   ;;  %vm585_vm4 = vcmask 195712  }
  0x33   : > { %365 = vmatpush.msra.mxu0 %v342_v1  ;;  %s1175_s22 = smov 88   ;;  %s1176_s15 = smov 104   ;;  %v664_v1 = vld [vmem:[%s1503_s3 + $0x18] sm:$0xff]  ;;  %vm658_vm5 = vcmask 261312   ;;  %vm764_vm10 = vcmask 523264  }
  0x34   : > { %s1177_s18 = smov 72   ;;  %s1178_s20 = smov 80  }
  0x35   : > { %366 = vmatpush.msra.mxu0 %v341_v2  ;;  %s1179_s21 = smov 112   ;;  %s1180_s11 = smov 40   ;;  %v663_v2 = vld [vmem:[%s1503_s3 + $0x10] sm:$0xff] }
  0x36   : > { %s1181_s10 = smov 8   ;;  %s1182_s26 = smov 48  }
  0x37   : > { %367 = vmatpush.msra.mxu0 %v340_v3  ;;  %s1183_s13 = smov 24   ;;  %v662_v3 = vld [vmem:[%s1503_s3 + $0x8] sm:$0xff] }
  0x38   : > { %922 = vmatmul.msk.f32.vlgmr.msra.gmra.mxu0 %vm348_vm0, %v1350_v4 }
  0xb5   : > { %v369_v6 = vpop.f32.mrf.mxu0 }
  0xb6   : > { %v370_v7 = vadd.f32 %v1014_v5, %v369_v6  ;;  %v661_v5 = vld [vmem:[%s1503_s3] sm:$0xff] }
  0xb8   : > { %373 = vst.msk [vmem:[#allocation2] sm:$0xff] %vm372_vm1, %v370_v7 }
  0xbf   : > { %v1357_v8 = vld [vmem:[#allocation2] sm:$0xff] }
  0xc0   : > { %443 = vrot.lane.b32.xlu1 %v1357_v8, %s1171_s14  ;;  %414 = vrot.lane.b32.xlu2 %v1357_v8, %s1172_s25  ;;  %s1184_s14 = smov 16  }
  0xc1   : > { %376 = vrot.lane.b32.xlu0 %v1357_v8, %s1173_s7 }
  0xc8   : > { %482 = vrot.lane.b32.xlu2 %v1357_v8, %s1174_s16 }
  0xc9   : > { %445 = vrot.lane.b32.xlu0 %v1357_v8, %s1175_s22 }
 0x11a   : > { %v415_v9 = vpop.permute.xlu2 %414 }
 0x11b   : > { %435 = vmatpush.msra.mxu2 %v415_v9  ;;  %v1405_v9 = vld [vmem:[#allocation7] sm:$0x3f] }
 0x122   : > { %v483_v10 = vpop.permute.xlu2 %482 }
 0x123   : > { %503 = vmatpush.msrb.mxu2 %v483_v10  ;;  %v665_v10 = vperm.slane %v1405_v9, 0 }
 0x132   : > { %v444_v13 = vpop.permute.xlu1 %443 }
 0x133   : > { %v377_v11 = vpop.permute.xlu0 %376 }
 0x134   : > { %923 = vmatpush.xpose.msk.msra.mxu1 %vm378_vm2, %v377_v11 }
 0x137   : > { %924 = vmatmul.msk.f32.vlgmr.msra.gmra.mxu1 %vm378_vm2, %v1357_v8 }
 0x13b   : > { %v446_v12 = vpop.permute.xlu0 %445 }
 0x13c   : > { %926 = vmatpush.xpose.msk.msra.mxu3 %vm378_vm2, %v446_v12 }
 0x13f   : > { %927 = vmatmul.msk.f32.vlgmr.msra.gmra.mxu3 %vm378_vm2, %v444_v13 }
 0x1b4   : > { %v400_v14 = vpop.f32.mrf.mxu1 }
 0x1b5   : > { %v403_v15 = vsel %vm378_vm2, %v400_v14, -inf }
 0x1b6   : > { %404 = vmax.xlane.f32.xlu1 %v403_v15 }
 0x1c2   : > { %v468_v16 = vpop.f32.mrf.mxu3 }
 0x1c3   : > { %v471_v17 = vsel %vm378_vm2, %v468_v16, -inf }
 0x1c4   : > { %472 = vmax.xlane.f32.xlu2 %v471_v17 }
 0x1cf   : > { %589 = vrot.lane.b32.xlu1 %v1357_v8, %s1176_s15 }
 0x1dc   : > { %591 = vrot.lane.b32.xlu2 %v1357_v8, %s1177_s18 }
 0x229   : > { %v405_v18 = vpop.xlane.xlu1 %404 }
 0x22a   : > { %v406_v19 = vsub.f32 %v400_v14, %v405_v18  ;;  %v1185_v14 = vmov 32.0  }
 0x22c   : > { %v407_v20 = vmul.f32 1.442695, %v406_v19 }
 0x22e   : > { %1016 = vpow2.f32 %v407_v20 }
 0x234   : > { %v1017_v21 = vpop.eup %1016 }
 0x235   : > { %v409_v22 = vsel %vm378_vm2, %v1017_v21, 0.0 }
 0x236   : > { %410 = vadd.xlane.f32.xlu2 %v409_v22 }
 0x237   : > { %v473_v23 = vpop.xlane.xlu2 %472 }
 0x238   : > { %v474_v24 = vsub.f32 %v468_v16, %v473_v23 }
 0x23a   : > { %v475_v25 = vmul.f32 1.442695, %v474_v24 }
 0x23c   : > { %1018 = vpow2.f32 %v475_v25 }
 0x23f   : > { %v592_v28 = vpop.permute.xlu2 %591 }
 0x241   : > { %v590_v36 = vpop.permute.xlu1 %589 }
 0x242   : > { %v1019_v26 = vpop.eup %1018 }
 0x243   : > { %v477_v27 = vsel %vm378_vm2, %v1019_v26, 0.0 }
 0x244   : > { %478 = vadd.xlane.f32.xlu0 %v477_v27  ;;  %v725_v27 = vld [vmem:[%s1504_s4 + $0x10] sm:$0xff] }
 0x24e   : > { %518 = vrot.lane.b32.xlu2 %v1357_v8, %s1178_s20 }
 0x258   : > { %516 = vrot.lane.b32.xlu0 %v1357_v8, %s1179_s21 }
 0x2a9   : > { %v411_v29 = vpop.xlane.xlu2 %410 }
 0x2aa   : > { %1020 = vrcp.f32 %v411_v29  ;;  %v723_v29 = vld [vmem:[%s1504_s4] sm:$0xff] }
 0x2b0   : > { %v1021_v30 = vpop.eup %1020 }
 0x2b1   : > { %v519_v31 = vpop.permute.xlu2 %518  ;;  %v413_v32 = vmul.f32 %v1021_v30, %v1017_v21  ;;  %v762_v30 = vld [vmem:[%s1506_s6 + $0x38] sm:$0xff] }
 0x2b2   : > { %929 = vmatpush.xpose.msk.msrb.mxu1 %vm378_vm2, %v519_v31  ;;  %v761_v31 = vld [vmem:[%s1506_s6 + $0x30] sm:$0xff]  ;;  %776 = vmatpush.msrb.mxu0 %v762_v30 }
 0x2b3   : > { %925 = vmatmul.msk.f32.vlgmr.msra.gmra.mxu2 %vm378_vm2, %v413_v32 }
 0x2b4   : > { %932 = vmatpush.xpose.msk.msra.mxu2 %vm378_vm2, %v592_v28  ;;  %v724_v28 = vld [vmem:[%s1504_s4 + $0x8] sm:$0xff]  ;;  %777 = vmatpush.msrb.mxu0 %v761_v31 }
 0x2b6   : > { %681 = vmatpush.msra.mxu1 %v664_v1 }
 0x2b7   : > { %v479_v33 = vpop.xlane.xlu0 %478 }
 0x2b8   : > { %1022 = vrcp.f32 %v479_v33  ;;  %682 = vmatpush.msra.mxu1 %v663_v2 }
 0x2ba   : > { %683 = vmatpush.msra.mxu1 %v662_v3 }
 0x2bc   : > { %684 = vmatpush.msra.mxu1 %v661_v5 }
 0x2be   : > { %v1023_v34 = vpop.eup %1022 }
 0x2bf   : > { %v481_v35 = vmul.f32 %v1023_v34, %v1019_v26  ;;  %v726_v26 = vld [vmem:[%s1504_s4 + $0x18] sm:$0xff]  ;;  %v760_v34 = vld [vmem:[%s1506_s6 + $0x28] sm:$0xff] }
 0x2c0   : > { %778 = vmatpush.msrb.mxu0 %v760_v34 }
 0x2c1   : > { %928 = vmatmul.msk.f32.vlgmr.msrb.gmra.mxu2 %vm378_vm2, %v481_v35 }
 0x2c9   : > { %933 = vmatmul.msk.f32.vlgmr.msra.gmra.mxu2 %vm378_vm2, %v590_v36  ;;  %v759_v36 = vld [vmem:[%s1506_s6 + $0x20] sm:$0xff] }
 0x2ca   : > { %v517_v37 = vpop.permute.xlu0 %516  ;;  %779 = vmatpush.msrb.mxu0 %v759_v36 }
 0x2cb   : > { %930 = vmatmul.msk.f32.vlgmr.msrb.gmra.mxu1 %vm378_vm2, %v517_v37  ;;  %v758_v37 = vld [vmem:[%s1506_s6 + $0x18] sm:$0xff] }
 0x2cc   : > { %780 = vmatpush.msrb.mxu0 %v758_v37 }
 0x336   : > { %v437_v38 = vpop.f32.mrf.mxu2 }
 0x337   : > { %440 = vst.msk [vmem:[#allocation3] sm:$0xff] %vm378_vm2, %v437_v38 }
 0x344   : > { %v505_v39 = vpop.f32.mrf.mxu2 }
 0x348   : > { %v541_v40 = vpop.f32.mrf.mxu1 }
 0x349   : > { %v544_v41 = vsel %vm378_vm2, %v541_v40, -inf }
 0x34a   : > { %545 = vmax.xlane.f32.xlu2 %v544_v41 }
 0x34c   : > { %v614_v42 = vpop.f32.mrf.mxu2 }
 0x34d   : > { %v617_v43 = vsel %vm378_vm2, %v614_v42, -inf }
 0x34e   : > { %618 = vmax.xlane.f32.xlu1 %v617_v43 }
 0x367   : > { %628 = vrot.lane.b32.xlu1 %v1357_v8, %s1180_s11  ;;  %s939_s11 = sshll.u32 %s1252_s9, 3  ;;  %s817_s9 = scalar_lea.sflag [#allocation6], %s1324_s24 }
 0x3bd   : > { %v546_v44 = vpop.xlane.xlu2 %545 }
 0x3be   : > { %v547_v45 = vsub.f32 %v541_v40, %v546_v44  ;;  %v718_v44 = vperm.slane %v1405_v9, 1 }
 0x3c0   : > { %v548_v46 = vmul.f32 1.442695, %v547_v45 }
 0x3c1   : > { %v619_v47 = vpop.xlane.xlu1 %618 }
 0x3c2   : > { %1024 = vpow2.f32 %v548_v46  ;;  %v620_v48 = vsub.f32 %v614_v42, %v619_v47  ;;  %v720_v46 = vperm.slane %v1405_v9, 2 }
 0x3c4   : > { %v621_v49 = vmul.f32 1.442695, %v620_v48 }
 0x3c6   : > { %1026 = vpow2.f32 %v621_v49 }
 0x3c8   : > { %v1025_v50 = vpop.eup %1024 }
 0x3c9   : > { %v550_v51 = vsel %vm378_vm2, %v1025_v50, 0.0 }
 0x3ca   : > { %551 = vadd.xlane.f32.xlu0 %v550_v51  ;;  %v757_v51 = vld [vmem:[%s1506_s6 + $0x10] sm:$0xff] }
 0x3cb   : > { %781 = vmatpush.msrb.mxu0 %v757_v51 }
 0x3cc   : > { %v1027_v52 = vpop.eup %1026 }
 0x3cd   : > { %v623_v53 = vsel %vm378_vm2, %v1027_v52, 0.0 }
 0x3ce   : > { %624 = vadd.xlane.f32.xlu2 %v623_v53  ;;  %v755_v53 = vld [vmem:[%s1506_s6] sm:$0xff] }
 0x3d9   : > { %v629_v54 = vpop.permute.xlu1 %628 }
 0x3da   : > { %649 = vmatpush.msrb.mxu2 %v629_v54 }
 0x3de   : > { %509 = vrot.lane.b32.xlu0 %v505_v39, %s1181_s10 }
 0x3e6   : > { %555 = vrot.lane.b32.xlu2 %v1357_v8, %s1182_s26 }
 0x43d   : > { %v552_v55 = vpop.xlane.xlu0 %551 }
 0x43e   : > { %1028 = vrcp.f32 %v552_v55 }
 0x441   : > { %v625_v56 = vpop.xlane.xlu2 %624 }
 0x442   : > { %1030 = vrcp.f32 %v625_v56 }
 0x443   : > { %1032 = vrcp.f32 %v1185_v14 }
 0x444   : > { %v1029_v57 = vpop.eup %1028 }
 0x445   : > { %v554_v61 = vmul.f32 %v1029_v57, %v1025_v50  ;;  %v763_v57 = vperm.slane %v1405_v9, 3 }
 0x448   : > { %v1031_v58 = vpop.eup %1030 }
 0x449   : > { %v627_v59 = vmul.f32 %v1031_v58, %v1027_v52  ;;  %v556_v60 = vpop.permute.xlu2 %555  ;;  %v1033_v15 = vpop.eup %1032  ;;  %v756_v52 = vld [vmem:[%s1506_s6 + $0x8] sm:$0xff] }
 0x44a   : > { %576 = vmatpush.msrb.mxu3 %v556_v60  ;;  %v693_v16 = vmul.f32 32.0, %v1033_v15  ;;  %vm697_vm6 = vweird.f32 %v1033_v15  ;;  %782 = vmatpush.msrb.mxu0 %v756_v52 }
 0x44b   : > { %931 = vmatmul.msk.f32.vlgmr.msrb.gmra.mxu3 %vm378_vm2, %v554_v61  ;;  %934 = vmatmul.msk.f32.vlgmr.msrb.gmra.mxu2 %vm378_vm2, %v627_v59 }
 0x44c   : > { %v694_v17 = vsub.f32 1.0, %v693_v16  ;;  %746 = vmatpush.msra.mxu3 %v726_v26  ;;  %783 = vmatpush.msrb.mxu0 %v755_v53 }
 0x44e   : > { %v695_v18 = vmul.f32 %v1033_v15, %v694_v17  ;;  %747 = vmatpush.msra.mxu3 %v725_v27 }
 0x450   : > { %v510_v62 = vpop.permute.xlu0 %509  ;;  %v696_v19 = vadd.f32 %v1033_v15, %v695_v18  ;;  %748 = vmatpush.msra.mxu3 %v724_v28 }
 0x451   : > { %513 = vst.msk [vmem:[#allocation3] sm:$0xff] %vm512_vm3, %v510_v62 }
 0x452   : > { %v1409_v20 = vsel %vm697_vm6, %v1033_v15, %v696_v19  ;;  %749 = vmatpush.msra.mxu3 %v723_v29  ;;  %v812_v15 = vperm.slane %v1405_v9, 5 }
 0x4ce   : > { %v578_v63 = vpop.f32.mrf.mxu3  ;;  %v651_v0 = vpop.f32.mrf.mxu2 }
 0x4cf   : > { %655 = vrot.lane.b32.xlu0 %v651_v0, %s1183_s13  ;;  %582 = vrot.lane.b32.xlu2 %v578_v63, %s1184_s14  ;;  %s827_s13 = scalar_lea.hbm %s1508_s8, %s939_s11  ;;  %s337_s14 = scalar_lea.vmem [#allocation9], %s919_s17 }
 0x4d0   : > { %s829_s25 = sshll.u32 %s337_s14, 4  ;;  %s831_s7 = sshll.u32 %s827_s13, 4  ;;  %s830_s25 = int_to_ptr.vmem [resolvable:$true] %s829_s25  ;;  %s832_s7 = int_to_ptr.hbm [resolvable:$true] %s831_s7 }
 0x4d1   : > { %s1112_s16 = sshra.s32 %s832_s7, 4  ;;  %s1118_s17 = scalar_lea.hbm %s1508_s8, 16  ;;  %s1113_s16 = int_to_ptr.hbm [resolvable:$true] %s1112_s16 }
 0x4d2   : > { %s1114_s22 = scalar_lea.hbm %s1113_s16, 8  ;;  %p1119_p9 = scmp.lt.s32.totalorder %s1113_s16, %s1508_s8 }
 0x4d3   : > { %p1115_p1 = scmp.ne.s32.totalorder %s1113_s16, %s1114_s22  ;;  %p1120_p10 = scmp.lt.s32.totalorder %s1118_s17, %s1114_s22 }
 0x4d5   : > { %p1116_p4 = pnand %p1115_p1, %p1297_p3  ;;  %p1121_p2 = por %p1120_p10, %p1119_p9 }
 0x4d7   : > { %p1117_p8 = pneg %p1116_p4 }
 0x4d9   : > { %p1122_p11 = pnand %p1121_p2, %p1117_p8 }
 0x529   : > { %v583_v6 = vpop.permute.xlu2 %582 }
 0x52a   : > { %586 = vst.msk [vmem:[#allocation3] sm:$0xff] %vm585_vm4, %v583_v6 }
 0x541   : > { %v656_v7 = vpop.permute.xlu0 %655 }
 0x542   : > { %659 = vst.msk [vmem:[#allocation3] sm:$0xff] %vm658_vm5, %v656_v7 }
 0x549   : > { %v660_v8 = vld [vmem:[#allocation3] sm:$0xff] }
 0x54a   : > { %935 = vmatmul.msk.f32.vlgmr.msra.gmra.mxu1 %vm348_vm0, %v660_v8 }
 0x5c7   : > { %v686_v11 = vpop.f32.mrf.mxu1 }
 0x5c8   : > { %v687_v12 = vadd.f32 %v686_v11, %v665_v10 }
 0x5ca   : > { %v689_v13 = vsel %vm348_vm0, %v687_v12, 0.0 }
 0x5cb   : > { %690 = vadd.xlane.f32.xlu1 %v689_v13  ;;  %v810_v13 = vperm.slane %v1405_v9, 4 }
 0x63e   : > { %v691_v21 = vpop.xlane.xlu1 %690 }
 0x63f   : > { %v699_v22 = vmul.f32 %v1409_v20, %v691_v21 }
 0x641   : > { %v700_v23 = vsub.f32 %v687_v12, %v699_v22 }
 0x643   : > { %v701_v24 = vmul.f32 %v700_v23, %v700_v23 }
 0x645   : > { %v702_v25 = vsel %vm348_vm0, %v701_v24, 0.0 }
 0x646   : > { %703 = vadd.xlane.f32.xlu2 %v702_v25 }
 0x6b9   : > { %v704_v32 = vpop.xlane.xlu2 %703 }
 0x6ba   : > { %v705_v33 = vmul.f32 %v704_v32, %v1409_v20 }
 0x6bc   : > { %v706_v35 = vadd.f32 1e-05, %v705_v33 }
 0x6be   : > { %1034 = vrsqrt.f32 %v706_v35  ;;  %vm713_vm8 = vweird.f32 %v706_v35 }
 0x6c4   : > { %v1035_v38 = vpop.eup %1034 }
 0x6c5   : > { %v708_v39 = vmul.f32 %v1035_v38, %v706_v35  ;;  %vm714_vm7 = vweird.f32 %v1035_v38 }
 0x6c6   : > { %vm715_vm9 = vmor %vm713_vm8, %vm714_vm7 }
 0x6c7   : > { %v709_v40 = vmul.f32 %v1035_v38, %v708_v39 }
 0x6c9   : > { %v710_v41 = vmul.f32 0.5, %v709_v40 }
 0x6cb   : > { %v711_v42 = vsub.f32 1.5, %v710_v41 }
 0x6cd   : > { %v712_v43 = vmul.f32 %v1035_v38, %v711_v42 }
 0x6cf   : > { %v716_v45 = vsel %vm715_vm9, %v1035_v38, %v712_v43 }
 0x6d0   : > { %v717_v47 = vmul.f32 %v716_v45, %v700_v23 }
 0x6d2   : > { %v719_v48 = vmul.f32 %v718_v44, %v717_v47 }
 0x6d4   : > { %v721_v49 = vadd.f32 %v720_v46, %v719_v48 }
 0x6d6   : > { %v722_v50 = vadd.f32 %v721_v49, %v1350_v4  ;;  %v1015_v4 = vld [vmem:[%s1505_s5] ss:$0 sm:$0xff] }
 0x6d8   : > { %936 = vmatmul.msk.f32.vlgmr.msra.gmra.mxu3 %vm348_vm0, %v722_v50 }
 0x75b   : > { %v751_v54 = vpop.f32.mrf.mxu3 }
 0x75c   : > { %v752_v55 = vadd.f32 %v1015_v4, %v751_v54 }
 0x75e   : > { %v754_v56 = vmax.f32 %v752_v55, 0.0 }
 0x760   : > { %937 = vmatmul.msk.f32.vlgmr.msrb.gmra.mxu0 %vm764_vm10, %v754_v56 }
 0x7dd   : > { %v785_v58 = vpop.f32.mrf.mxu0 }
 0x7de   : > { %v786_v59 = vadd.f32 %v785_v58, %v763_v57 }
 0x7e0   : > { %v788_v60 = vsel %vm348_vm0, %v786_v59, 0.0 }
 0x7e1   : > { %789 = vadd.xlane.f32.xlu0 %v788_v60 }
 0x854   : > { %v790_v61 = vpop.xlane.xlu0 %789 }
 0x855   : > { %v791_v62 = vmul.f32 %v790_v61, %v1409_v20 }
 0x857   : > { %v792_v63 = vsub.f32 %v786_v59, %v791_v62 }
 0x859   : > { %v793_v0 = vmul.f32 %v792_v63, %v792_v63 }
 0x85b   : > { %v794_v1 = vsel %vm348_vm0, %v793_v0, 0.0 }
 0x85c   : > { %795 = vadd.xlane.f32.xlu1 %v794_v1 }
 0x8cf   : > { %v796_v2 = vpop.xlane.xlu1 %795 }
 0x8d0   : > { %v797_v3 = vmul.f32 %v796_v2, %v1409_v20 }
 0x8d2   : > { %v798_v5 = vadd.f32 1e-05, %v797_v3 }
 0x8d4   : > { %1036 = vrsqrt.f32 %v798_v5  ;;  %vm805_vm12 = vweird.f32 %v798_v5 }
 0x8da   : > { %v1037_v6 = vpop.eup %1036 }
 0x8db   : > { %v800_v7 = vmul.f32 %v1037_v6, %v798_v5  ;;  %vm806_vm11 = vweird.f32 %v1037_v6 }
 0x8dc   : > { %vm807_vm13 = vmor %vm805_vm12, %vm806_vm11 }
 0x8dd   : > { %v801_v8 = vmul.f32 %v1037_v6, %v800_v7 }
 0x8df   : > { %v802_v10 = vmul.f32 0.5, %v801_v8 }
 0x8e1   : > { %v803_v11 = vsub.f32 1.5, %v802_v10 }
 0x8e3   : > { %v804_v12 = vmul.f32 %v1037_v6, %v803_v11 }
 0x8e5   : > { %v808_v14 = vsel %vm807_vm13, %v1037_v6, %v804_v12 }
 0x8e6   : > { %v809_v16 = vmul.f32 %v808_v14, %v792_v63 }
 0x8e8   : > { %v811_v17 = vmul.f32 %v810_v13, %v809_v16 }
 0x8ea   : > { %v813_v18 = vadd.f32 %v812_v15, %v811_v17 }
 0x8ec   : > { %v814_v19 = vadd.f32 %v813_v18, %v722_v50 }
 0x8ee   : > { %815 = vst.msk [vmem:[%s337_s14] sm:$0xff] %vm348_vm0, %v814_v19 }
 0x8ef   : > { %1125 = shalt.err (!%p1122_p11)
}
 0x8f0   : > { %948 = dma.vmem_to_hbm [thread:$0]  (%p1297_p3), %s830_s25, 128, %s832_s7, %s817_s9  }
 0x8f1 PF: > { %s843_s24 = sand.u32 1, %s1156_s27   ;;  %p1517_p12 = scmp.ge.s32.totalorder %s1168_s30, 2 }
 0x8f2   : > { %s844_s11 = scalar_lea.sflag [#allocation6], %s843_s24 }
 0x8f3   : > { %p959_p13 = pnand %p1517_p12, %p1266_p6 }
 0x8f5   : > { %p960_p0 = pneg %p959_p13 }
 0x8f7   : > { %1151 = dma.done.wait (%p960_p0), %s844_s11, 128  }
 0x8f8   : > { %1153 = vsyncadd (%p960_p0), %s844_s11, 4294967168  ;;  %s1518_s10 = sld [smem:[#allocation13_spill]]  ;;  %p22_p5 = scmp.ge.s32.totalorder %s1284_s19, 4  }
 0x8f9   : > { %s1519_s27 = smov %s1160_s28  ;;  %s1520_s28 = smov %s1164_s29 }
 0x8fa   : > { %s1522_s30 = smov %s1284_s19  ;;  %24 = sbr.rel (!%p22_p5) target bundleno = 8 (0x8), region = 101 }
 0x8fe   : > { %s1521_s29 = smov %s1518_s10 }
 0x8ff   :  { %850 = vsyncpa [#allocation5], 1 }
 0x900   :  { %852 = vsyncpa [#allocation5 + $0x1], 1 }
 0x901   :  { %853 = vsyncpa [#allocation8], 1 }
 0x902   :  { %854 = vsyncpa [#allocation6], 1 }
 0x903   :  { %856 = vsyncpa [#allocation6 + $0x1], 1 }

// kernel: tpu_custom_call.1
= control target key start
LH: loop header
LB: loop body
LE: loop exit
PB: predicated region body
PF: predicated region fallthrough
CT: control target
= control target key end

     0   :  { %s1500_s0 = inlined_call_operand.hbm [shape: f32[16,32], index: 0, kind: input, shape index: {}]   ;;  %s1501_s1 = inlined_call_operand.vmem [shape: f32[32,96], index: 1, kind: input, shape index: {}]   ;;  %s1502_s2 = inlined_call_operand.vmem [shape: f32[1,96], index: 2, kind: input, shape index: {}]   ;;  %s1503_s3 = inlined_call_operand.vmem [shape: f32[32,32], index: 3, kind: input, shape index: {}]   ;;  %s1504_s4 = inlined_call_operand.vmem [shape: f32[32,64], index: 4, kind: input, shape index: {}]   ;;  %s1505_s5 = inlined_call_operand.vmem [shape: f32[1,64], index: 5, kind: input, shape index: {}]   ;;  %s1506_s6 = inlined_call_operand.vmem [shape: f32[64,32], index: 6, kind: input, shape index: {}]   ;;  %s1507_s7 = inlined_call_operand.hbm [shape: f32[6,32], index: 7, kind: input, shape index: {}]   ;;  %s1508_s8 = inlined_call_operand.hbm [shape: f32[16,32], index: 8, kind: output, shape index: {}]  }
   0x1   :  { %1509 = sst [smem:[#allocation14_spill]] %s1507_s7 }
   0x2   :  { %13 = vsyncpa [#allocation5], 0 }
   0x3   :  { %15 = vsyncpa [#allocation5 + $0x1], 0 }
   0x4   :  { %16 = vsyncpa [#allocation8], 0 }
   0x5   :  { %17 = vsyncpa [#allocation6], 0 }
   0x6   :  { %19 = vsyncpa [#allocation6 + $0x1], 0  ;;  %s1231_s27 = smov 0   ;;  %s1233_s28 = smov 0  }
   0x7   :  { %s1235_s29 = smov 0   ;;  %s1237_s30 = smov 0  }
   0x8 LB: > { %s1252_s9 = sadd.s32 4294967295, %s1168_s30   ;;  %s912_s10 = sadd.s32 4294967294, %s1168_s30   ;;  %s1168_s30 = sphi %s1237_s30, %s1522_s30   ;;  %s1164_s29 = sphi %s1235_s29, %s1521_s29   ;;  %s1160_s28 = sphi %s1233_s28, %s1520_s28   ;;  %s1156_s27 = sphi %s1231_s27, %s1519_s27  }
   0x9   : > { %p45_p0 = scmp.ne.s32.totalorder %s1160_s28, %s1156_s27  ;;  %p46_p1 = scmp.eq.s32.totalorder %s1252_s9, 0 }
   0xa   : > { %p216_p2 = scmp.eq.s32.totalorder %s1252_s9, 1  ;;  %p222_p3 = scmp.eq.s32.totalorder %s912_s10, 1 }
   0xb   : > { %p1261_p4 = por %p46_p1, %p45_p0  ;;  %p913_p5 = scmp.ge.s32.totalorder %s1168_s30, 1 }
   0xc   : > { %p1266_p6 = por %p222_p3, %p45_p0  ;;  %p229_p7 = scmp.lt.s32.totalorder %s1168_s30, 3 }
   0xd   : > { %s1512_s7 = sld [smem:[#allocation14_spill]]  ;;  %s1170_s17 = smov [#allocation7]  }
   0xe   : > { %p1274_p8 = pnand %p913_p5, %p229_p7  ;;  %s261_s18 = sshll.u32 %s1170_s17, 4  ;;  %s262_s18 = int_to_ptr.vmem [resolvable:$true] %s261_s18 }
   0xf   : > { %s1284_s19 = sadd.s32 1, %s1168_s30   ;;  %s32_s20 = sadd.s32 1, %s1164_s29 }
  0x10   : > { %p950_p10 = pneg %p1274_p8  ;;  %s29_s21 = ssub.s32 %s1168_s30, %s1284_s19 }
  0x11   : > { %p30_p12 = scmp.eq.s32.totalorder %s29_s21, 0  ;;  %p39_p13 = scmp.ne.s32.totalorder %s1164_s29, %s1160_s28 }
  0x12   : > { %p951_p11 = pnand %p950_p10, %p46_p1  ;;  %p40_p0 = scmp.eq.s32.totalorder %s1168_s30, 0 }
  0x13   : > { %s259_s15 = sshll.u32 %s1512_s7, 4  ;;  %p1297_p3 = por %p216_p2, %p39_p13  ;;  %s260_s15 = int_to_ptr.hbm [resolvable:$true] %s259_s15 }
  0x14   : > { %953 = dma.hbm_to_vmem [thread:$0]  (!%p951_p11), %s260_s15, 128, %s262_s18, [#allocation8]  }
  0x15   : > { %s1293_s22 = scalar_select %p30_p12, %s1164_s29, %s32_s20  }
  0x16   : > { %p963_p5 = scmp.lt.s32.totalorder %s1168_s30, 2  ;;  %s272_s24 = sand.u32 1, %s1164_s29  }
  0x17   : > { %1514 = sst [smem:[#allocation13_spill]] %s1293_s22  ;;  %s917_s25 = sshll.u32 %s1168_s30, 3 }
  0x18   : > { %p41_p7 = por %p40_p0, %p39_p13  ;;  %s916_s26 = sshll.u32 %s272_s24, 3 }
  0x19   : > { %s280_s14 = scalar_lea.hbm %s1500_s0, %s917_s25  ;;  %s276_s17 = scalar_lea.vmem [#allocation4], %s916_s26 }
  0x1a   : > { %s282_s15 = sshll.u32 %s280_s14, 4  ;;  %s284_s18 = sshll.u32 %s276_s17, 4  ;;  %s283_s15 = int_to_ptr.hbm [resolvable:$true] %s282_s15  ;;  %s285_s18 = int_to_ptr.vmem [resolvable:$true] %s284_s18 }
  0x1b   : > { %p1307_p10 = pnand %p963_p5, %p41_p7  ;;  %s273_s21 = scalar_lea.sflag [#allocation5], %s272_s24 }
  0x1c   : > { %s1068_s7 = sshra.s32 %s283_s15, 4  ;;  %s1075_s26 = scalar_lea.hbm %s1500_s0, 16  ;;  %s1069_s7 = int_to_ptr.hbm [resolvable:$true] %s1068_s7 }
  0x1d   : > { %s1070_s22 = scalar_lea.hbm %s1069_s7, 8  ;;  %p1072_p11 = pneg %p1307_p10 }
  0x1e   : > { %p1071_p2 = scmp.ne.s32.totalorder %s1069_s7, %s1070_s22  ;;  %p1076_p0 = scmp.lt.s32.totalorder %s1069_s7, %s1500_s0 }
  0x1f   : > { %p1077_p5 = scmp.lt.s32.totalorder %s1075_s26, %s1070_s22 }
  0x20   : > { %p1073_p12 = pnand %p1072_p11, %p1071_p2 }
  0x21   : > { %p1078_p7 = por %p1077_p5, %p1076_p0 }
  0x22   : > { %p1074_p13 = pneg %p1073_p12 }
  0x24   : > { %p1079_p9 = pnand %p1078_p7, %p1074_p13 }
  0x26   : > { %1082 = shalt.err (!%p1079_p9)
}
  0x27   : > { %957 = dma.hbm_to_vmem [thread:$0]  (!%p1307_p10), %s283_s15, 128, %s285_s18, %s273_s21  }
  0x28   : > { %293 = sbr.rel (%p1274_p8) target bundleno = 2289 (0x8f1), region = 52  ;;  %s1324_s24 = sand.u32 (!%p1274_p8), 1, %s1160_s28  }
  0x29   : > { %s919_s17 = sshll.u32 (!%p1274_p8), %s1324_s24, 3  ;;  %s296_s25 = scalar_lea.sflag (!%p1274_p8), [#allocation5], %s1324_s24 }
  0x2a   : > { %s299_s7 = scalar_lea.vmem (!%p1274_p8), [#allocation4], %s919_s17 }
  0x2d   : > { %1143 = dma.done.wait (%p1261_p4), %s296_s25, 128  }
  0x2e   : > { %1145 = vsyncadd (%p1261_p4), %s296_s25, 4294967168 }
  0x2f   : > { %1147 = dma.done.wait (%p46_p1), [#allocation8], 128  }
  0x30   : > { %1149 = vsyncadd (%p46_p1), [#allocation8], 4294967168  ;;  %v343_v0 = vld [vmem:[%s1501_s1 + $0x18] sm:$0xff]  ;;  %v342_v1 = vld [vmem:[%s1501_s1 + $0x10] sm:$0xff]  ;;  %vm348_vm0 = vcmask 261120   ;;  %vm372_vm1 = vcmask 785408  }
  0x31   : > { %364 = vmatpush.msra.mxu0 %v343_v0  ;;  %v341_v2 = vld [vmem:[%s1501_s1 + $0x8] sm:$0xff]  ;;  %v340_v3 = vld [vmem:[%s1501_s1] sm:$0xff]  ;;  %v1350_v4 = vld [vmem:[%s299_s7] sm:$0xff]  ;;  %s1171_s14 = smov 120   ;;  %s1172_s25 = smov 64   ;;  %vm378_vm2 = vcmask 64512  }
  0x32   : > { %v1014_v5 = vld [vmem:[%s1502_s2] ss:$0 sm:$0xff]  ;;  %s1173_s7 = smov 96   ;;  %s1174_s16 = smov 56   ;;  %vm512_vm3 = vcmask 130112   ;;  %vm585_vm4 = vcmask 195712  }
  0x33   : > { %365 = vmatpush.msra.mxu0 %v342_v1  ;;  %s1175_s22 = smov 88   ;;  %s1176_s15 = smov 104   ;;  %v664_v1 = vld [vmem:[%s1503_s3 + $0x18] sm:$0xff]  ;;  %vm658_vm5 = vcmask 261312   ;;  %vm764_vm10 = vcmask 523264  }
  0x34   : > { %s1177_s18 = smov 72   ;;  %s1178_s20 = smov 80  }
  0x35   : > { %366 = vmatpush.msra.mxu0 %v341_v2  ;;  %s1179_s21 = smov 112   ;;  %s1180_s11 = smov 40   ;;  %v663_v2 = vld [vmem:[%s1503_s3 + $0x10] sm:$0xff] }
  0x36   : > { %s1181_s10 = smov 8   ;;  %s1182_s26 = smov 48  }
  0x37   : > { %367 = vmatpush.msra.mxu0 %v340_v3  ;;  %s1183_s13 = smov 24   ;;  %v662_v3 = vld [vmem:[%s1503_s3 + $0x8] sm:$0xff] }
  0x38   : > { %922 = vmatmul.msk.f32.vlgmr.msra.gmra.mxu0 %vm348_vm0, %v1350_v4 }
  0xb5   : > { %v369_v6 = vpop.f32.mrf.mxu0 }
  0xb6   : > { %v370_v7 = vadd.f32 %v1014_v5, %v369_v6  ;;  %v661_v5 = vld [vmem:[%s1503_s3] sm:$0xff] }
  0xb8   : > { %373 = vst.msk [vmem:[#allocation2] sm:$0xff] %vm372_vm1, %v370_v7 }
  0xbf   : > { %v1357_v8 = vld [vmem:[#allocation2] sm:$0xff] }
  0xc0   : > { %443 = vrot.lane.b32.xlu1 %v1357_v8, %s1171_s14  ;;  %414 = vrot.lane.b32.xlu2 %v1357_v8, %s1172_s25  ;;  %s1184_s14 = smov 16  }
  0xc1   : > { %376 = vrot.lane.b32.xlu0 %v1357_v8, %s1173_s7 }
  0xc8   : > { %482 = vrot.lane.b32.xlu2 %v1357_v8, %s1174_s16 }
  0xc9   : > { %445 = vrot.lane.b32.xlu0 %v1357_v8, %s1175_s22 }
 0x11a   : > { %v415_v9 = vpop.permute.xlu2 %414 }
 0x11b   : > { %435 = vmatpush.msra.mxu2 %v415_v9  ;;  %v1405_v9 = vld [vmem:[#allocation7] sm:$0x3f] }
 0x122   : > { %v483_v10 = vpop.permute.xlu2 %482 }
 0x123   : > { %503 = vmatpush.msrb.mxu2 %v483_v10  ;;  %v665_v10 = vperm.slane %v1405_v9, 0 }
 0x132   : > { %v444_v13 = vpop.permute.xlu1 %443 }
 0x133   : > { %v377_v11 = vpop.permute.xlu0 %376 }
 0x134   : > { %923 = vmatpush.xpose.msk.msra.mxu1 %vm378_vm2, %v377_v11 }
 0x137   : > { %924 = vmatmul.msk.f32.vlgmr.msra.gmra.mxu1 %vm378_vm2, %v1357_v8 }
 0x13b   : > { %v446_v12 = vpop.permute.xlu0 %445 }
 0x13c   : > { %926 = vmatpush.xpose.msk.msra.mxu3 %vm378_vm2, %v446_v12 }
 0x13f   : > { %927 = vmatmul.msk.f32.vlgmr.msra.gmra.mxu3 %vm378_vm2, %v444_v13 }
 0x1b4   : > { %v400_v14 = vpop.f32.mrf.mxu1 }
 0x1b5   : > { %v403_v15 = vsel %vm378_vm2, %v400_v14, -inf }
 0x1b6   : > { %404 = vmax.xlane.f32.xlu1 %v403_v15 }
 0x1c2   : > { %v468_v16 = vpop.f32.mrf.mxu3 }
 0x1c3   : > { %v471_v17 = vsel %vm378_vm2, %v468_v16, -inf }
 0x1c4   : > { %472 = vmax.xlane.f32.xlu2 %v471_v17 }
 0x1cf   : > { %589 = vrot.lane.b32.xlu1 %v1357_v8, %s1176_s15 }
 0x1dc   : > { %591 = vrot.lane.b32.xlu2 %v1357_v8, %s1177_s18 }
 0x229   : > { %v405_v18 = vpop.xlane.xlu1 %404 }
 0x22a   : > { %v406_v19 = vsub.f32 %v400_v14, %v405_v18  ;;  %v1185_v14 = vmov 32.0  }
 0x22c   : > { %v407_v20 = vmul.f32 1.442695, %v406_v19 }
 0x22e   : > { %1016 = vpow2.f32 %v407_v20 }
 0x234   : > { %v1017_v21 = vpop.eup %1016 }
 0x235   : > { %v409_v22 = vsel %vm378_vm2, %v1017_v21, 0.0 }
 0x236   : > { %410 = vadd.xlane.f32.xlu2 %v409_v22 }
 0x237   : > { %v473_v23 = vpop.xlane.xlu2 %472 }
 0x238   : > { %v474_v24 = vsub.f32 %v468_v16, %v473_v23 }
 0x23a   : > { %v475_v25 = vmul.f32 1.442695, %v474_v24 }
 0x23c   : > { %1018 = vpow2.f32 %v475_v25 }
 0x23f   : > { %v592_v28 = vpop.permute.xlu2 %591 }
 0x241   : > { %v590_v36 = vpop.permute.xlu1 %589 }
 0x242   : > { %v1019_v26 = vpop.eup %1018 }
 0x243   : > { %v477_v27 = vsel %vm378_vm2, %v1019_v26, 0.0 }
 0x244   : > { %478 = vadd.xlane.f32.xlu0 %v477_v27  ;;  %v725_v27 = vld [vmem:[%s1504_s4 + $0x10] sm:$0xff] }
 0x24e   : > { %518 = vrot.lane.b32.xlu2 %v1357_v8, %s1178_s20 }
 0x258   : > { %516 = vrot.lane.b32.xlu0 %v1357_v8, %s1179_s21 }
 0x2a9   : > { %v411_v29 = vpop.xlane.xlu2 %410 }
 0x2aa   : > { %1020 = vrcp.f32 %v411_v29  ;;  %v723_v29 = vld [vmem:[%s1504_s4] sm:$0xff] }
 0x2b0   : > { %v1021_v30 = vpop.eup %1020 }
 0x2b1   : > { %v519_v31 = vpop.permute.xlu2 %518  ;;  %v413_v32 = vmul.f32 %v1021_v30, %v1017_v21  ;;  %v762_v30 = vld [vmem:[%s1506_s6 + $0x38] sm:$0xff] }
 0x2b2   : > { %929 = vmatpush.xpose.msk.msrb.mxu1 %vm378_vm2, %v519_v31  ;;  %v761_v31 = vld [vmem:[%s1506_s6 + $0x30] sm:$0xff]  ;;  %776 = vmatpush.msrb.mxu0 %v762_v30 }
 0x2b3   : > { %925 = vmatmul.msk.f32.vlgmr.msra.gmra.mxu2 %vm378_vm2, %v413_v32 }
 0x2b4   : > { %932 = vmatpush.xpose.msk.msra.mxu2 %vm378_vm2, %v592_v28  ;;  %v724_v28 = vld [vmem:[%s1504_s4 + $0x8] sm:$0xff]  ;;  %777 = vmatpush.msrb.mxu0 %v761_v31 }
 0x2b6   : > { %681 = vmatpush.msra.mxu1 %v664_v1 }
 0x2b7   : > { %v479_v33 = vpop.xlane.xlu0 %478 }
 0x2b8   : > { %1022 = vrcp.f32 %v479_v33  ;;  %682 = vmatpush.msra.mxu1 %v663_v2 }
 0x2ba   : > { %683 = vmatpush.msra.mxu1 %v662_v3 }
 0x2bc   : > { %684 = vmatpush.msra.mxu1 %v661_v5 }
 0x2be   : > { %v1023_v34 = vpop.eup %1022 }
 0x2bf   : > { %v481_v35 = vmul.f32 %v1023_v34, %v1019_v26  ;;  %v726_v26 = vld [vmem:[%s1504_s4 + $0x18] sm:$0xff]  ;;  %v760_v34 = vld [vmem:[%s1506_s6 + $0x28] sm:$0xff] }
 0x2c0   : > { %778 = vmatpush.msrb.mxu0 %v760_v34 }
 0x2c1   : > { %928 = vmatmul.msk.f32.vlgmr.msrb.gmra.mxu2 %vm378_vm2, %v481_v35 }
 0x2c9   : > { %933 = vmatmul.msk.f32.vlgmr.msra.gmra.mxu2 %vm378_vm2, %v590_v36  ;;  %v759_v36 = vld [vmem:[%s1506_s6 + $0x20] sm:$0xff] }
 0x2ca   : > { %v517_v37 = vpop.permute.xlu0 %516  ;;  %779 = vmatpush.msrb.mxu0 %v759_v36 }
 0x2cb   : > { %930 = vmatmul.msk.f32.vlgmr.msrb.gmra.mxu1 %vm378_vm2, %v517_v37  ;;  %v758_v37 = vld [vmem:[%s1506_s6 + $0x18] sm:$0xff] }
 0x2cc   : > { %780 = vmatpush.msrb.mxu0 %v758_v37 }
 0x336   : > { %v437_v38 = vpop.f32.mrf.mxu2 }
 0x337   : > { %440 = vst.msk [vmem:[#allocation3] sm:$0xff] %vm378_vm2, %v437_v38 }
 0x344   : > { %v505_v39 = vpop.f32.mrf.mxu2 }
 0x348   : > { %v541_v40 = vpop.f32.mrf.mxu1 }
 0x349   : > { %v544_v41 = vsel %vm378_vm2, %v541_v40, -inf }
 0x34a   : > { %545 = vmax.xlane.f32.xlu2 %v544_v41 }
 0x34c   : > { %v614_v42 = vpop.f32.mrf.mxu2 }
 0x34d   : > { %v617_v43 = vsel %vm378_vm2, %v614_v42, -inf }
 0x34e   : > { %618 = vmax.xlane.f32.xlu1 %v617_v43 }
 0x367   : > { %628 = vrot.lane.b32.xlu1 %v1357_v8, %s1180_s11  ;;  %s939_s11 = sshll.u32 %s1252_s9, 3  ;;  %s817_s9 = scalar_lea.sflag [#allocation6], %s1324_s24 }
 0x3bd   : > { %v546_v44 = vpop.xlane.xlu2 %545 }
 0x3be   : > { %v547_v45 = vsub.f32 %v541_v40, %v546_v44  ;;  %v718_v44 = vperm.slane %v1405_v9, 1 }
 0x3c0   : > { %v548_v46 = vmul.f32 1.442695, %v547_v45 }
 0x3c1   : > { %v619_v47 = vpop.xlane.xlu1 %618 }
 0x3c2   : > { %1024 = vpow2.f32 %v548_v46  ;;  %v620_v48 = vsub.f32 %v614_v42, %v619_v47  ;;  %v720_v46 = vperm.slane %v1405_v9, 2 }
 0x3c4   : > { %v621_v49 = vmul.f32 1.442695, %v620_v48 }
 0x3c6   : > { %1026 = vpow2.f32 %v621_v49 }
 0x3c8   : > { %v1025_v50 = vpop.eup %1024 }
 0x3c9   : > { %v550_v51 = vsel %vm378_vm2, %v1025_v50, 0.0 }
 0x3ca   : > { %551 = vadd.xlane.f32.xlu0 %v550_v51  ;;  %v757_v51 = vld [vmem:[%s1506_s6 + $0x10] sm:$0xff] }
 0x3cb   : > { %781 = vmatpush.msrb.mxu0 %v757_v51 }
 0x3cc   : > { %v1027_v52 = vpop.eup %1026 }
 0x3cd   : > { %v623_v53 = vsel %vm378_vm2, %v1027_v52, 0.0 }
 0x3ce   : > { %624 = vadd.xlane.f32.xlu2 %v623_v53  ;;  %v755_v53 = vld [vmem:[%s1506_s6] sm:$0xff] }
 0x3d9   : > { %v629_v54 = vpop.permute.xlu1 %628 }
 0x3da   : > { %649 = vmatpush.msrb.mxu2 %v629_v54 }
 0x3de   : > { %509 = vrot.lane.b32.xlu0 %v505_v39, %s1181_s10 }
 0x3e6   : > { %555 = vrot.lane.b32.xlu2 %v1357_v8, %s1182_s26 }
 0x43d   : > { %v552_v55 = vpop.xlane.xlu0 %551 }
 0x43e   : > { %1028 = vrcp.f32 %v552_v55 }
 0x441   : > { %v625_v56 = vpop.xlane.xlu2 %624 }
 0x442   : > { %1030 = vrcp.f32 %v625_v56 }
 0x443   : > { %1032 = vrcp.f32 %v1185_v14 }
 0x444   : > { %v1029_v57 = vpop.eup %1028 }
 0x445   : > { %v554_v61 = vmul.f32 %v1029_v57, %v1025_v50  ;;  %v763_v57 = vperm.slane %v1405_v9, 3 }
 0x448   : > { %v1031_v58 = vpop.eup %1030 }
 0x449   : > { %v627_v59 = vmul.f32 %v1031_v58, %v1027_v52  ;;  %v556_v60 = vpop.permute.xlu2 %555  ;;  %v1033_v15 = vpop.eup %1032  ;;  %v756_v52 = vld [vmem:[%s1506_s6 + $0x8] sm:$0xff] }
 0x44a   : > { %576 = vmatpush.msrb.mxu3 %v556_v60  ;;  %v693_v16 = vmul.f32 32.0, %v1033_v15  ;;  %vm697_vm6 = vweird.f32 %v1033_v15  ;;  %782 = vmatpush.msrb.mxu0 %v756_v52 }
 0x44b   : > { %931 = vmatmul.msk.f32.vlgmr.msrb.gmra.mxu3 %vm378_vm2, %v554_v61  ;;  %934 = vmatmul.msk.f32.vlgmr.msrb.gmra.mxu2 %vm378_vm2, %v627_v59 }
 0x44c   : > { %v694_v17 = vsub.f32 1.0, %v693_v16  ;;  %746 = vmatpush.msra.mxu3 %v726_v26  ;;  %783 = vmatpush.msrb.mxu0 %v755_v53 }
 0x44e   : > { %v695_v18 = vmul.f32 %v1033_v15, %v694_v17  ;;  %747 = vmatpush.msra.mxu3 %v725_v27 }
 0x450   : > { %v510_v62 = vpop.permute.xlu0 %509  ;;  %v696_v19 = vadd.f32 %v1033_v15, %v695_v18  ;;  %748 = vmatpush.msra.mxu3 %v724_v28 }
 0x451   : > { %513 = vst.msk [vmem:[#allocation3] sm:$0xff] %vm512_vm3, %v510_v62 }
 0x452   : > { %v1409_v20 = vsel %vm697_vm6, %v1033_v15, %v696_v19  ;;  %749 = vmatpush.msra.mxu3 %v723_v29  ;;  %v812_v15 = vperm.slane %v1405_v9, 5 }
 0x4ce   : > { %v578_v63 = vpop.f32.mrf.mxu3  ;;  %v651_v0 = vpop.f32.mrf.mxu2 }
 0x4cf   : > { %655 = vrot.lane.b32.xlu0 %v651_v0, %s1183_s13  ;;  %582 = vrot.lane.b32.xlu2 %v578_v63, %s1184_s14  ;;  %s827_s13 = scalar_lea.hbm %s1508_s8, %s939_s11  ;;  %s337_s14 = scalar_lea.vmem [#allocation9], %s919_s17 }
 0x4d0   : > { %s829_s25 = sshll.u32 %s337_s14, 4  ;;  %s831_s7 = sshll.u32 %s827_s13, 4  ;;  %s830_s25 = int_to_ptr.vmem [resolvable:$true] %s829_s25  ;;  %s832_s7 = int_to_ptr.hbm [resolvable:$true] %s831_s7 }
 0x4d1   : > { %s1112_s16 = sshra.s32 %s832_s7, 4  ;;  %s1118_s17 = scalar_lea.hbm %s1508_s8, 16  ;;  %s1113_s16 = int_to_ptr.hbm [resolvable:$true] %s1112_s16 }
 0x4d2   : > { %s1114_s22 = scalar_lea.hbm %s1113_s16, 8  ;;  %p1119_p9 = scmp.lt.s32.totalorder %s1113_s16, %s1508_s8 }
 0x4d3   : > { %p1115_p1 = scmp.ne.s32.totalorder %s1113_s16, %s1114_s22  ;;  %p1120_p10 = scmp.lt.s32.totalorder %s1118_s17, %s1114_s22 }
 0x4d5   : > { %p1116_p4 = pnand %p1115_p1, %p1297_p3  ;;  %p1121_p2 = por %p1120_p10, %p1119_p9 }
 0x4d7   : > { %p1117_p8 = pneg %p1116_p4 }
 0x4d9   : > { %p1122_p11 = pnand %p1121_p2, %p1117_p8 }
 0x529   : > { %v583_v6 = vpop.permute.xlu2 %582 }
 0x52a   : > { %586 = vst.msk [vmem:[#allocation3] sm:$0xff] %vm585_vm4, %v583_v6 }
 0x541   : > { %v656_v7 = vpop.permute.xlu0 %655 }
 0x542   : > { %659 = vst.msk [vmem:[#allocation3] sm:$0xff] %vm658_vm5, %v656_v7 }
 0x549   : > { %v660_v8 = vld [vmem:[#allocation3] sm:$0xff] }
 0x54a   : > { %935 = vmatmul.msk.f32.vlgmr.msra.gmra.mxu1 %vm348_vm0, %v660_v8 }
 0x5c7   : > { %v686_v11 = vpop.f32.mrf.mxu1 }
 0x5c8   : > { %v687_v12 = vadd.f32 %v686_v11, %v665_v10 }
 0x5ca   : > { %v689_v13 = vsel %vm348_vm0, %v687_v12, 0.0 }
 0x5cb   : > { %690 = vadd.xlane.f32.xlu1 %v689_v13  ;;  %v810_v13 = vperm.slane %v1405_v9, 4 }
 0x63e   : > { %v691_v21 = vpop.xlane.xlu1 %690 }
 0x63f   : > { %v699_v22 = vmul.f32 %v1409_v20, %v691_v21 }
 0x641   : > { %v700_v23 = vsub.f32 %v687_v12, %v699_v22 }
 0x643   : > { %v701_v24 = vmul.f32 %v700_v23, %v700_v23 }
 0x645   : > { %v702_v25 = vsel %vm348_vm0, %v701_v24, 0.0 }
 0x646   : > { %703 = vadd.xlane.f32.xlu2 %v702_v25 }
 0x6b9   : > { %v704_v32 = vpop.xlane.xlu2 %703 }
 0x6ba   : > { %v705_v33 = vmul.f32 %v704_v32, %v1409_v20 }
 0x6bc   : > { %v706_v35 = vadd.f32 1e-05, %v705_v33 }
 0x6be   : > { %1034 = vrsqrt.f32 %v706_v35  ;;  %vm713_vm8 = vweird.f32 %v706_v35 }
 0x6c4   : > { %v1035_v38 = vpop.eup %1034 }
 0x6c5   : > { %v708_v39 = vmul.f32 %v1035_v38, %v706_v35  ;;  %vm714_vm7 = vweird.f32 %v1035_v38 }
 0x6c6   : > { %vm715_vm9 = vmor %vm713_vm8, %vm714_vm7 }
 0x6c7   : > { %v709_v40 = vmul.f32 %v1035_v38, %v708_v39 }
 0x6c9   : > { %v710_v41 = vmul.f32 0.5, %v709_v40 }
 0x6cb   : > { %v711_v42 = vsub.f32 1.5, %v710_v41 }
 0x6cd   : > { %v712_v43 = vmul.f32 %v1035_v38, %v711_v42 }
 0x6cf   : > { %v716_v45 = vsel %vm715_vm9, %v1035_v38, %v712_v43 }
 0x6d0   : > { %v717_v47 = vmul.f32 %v716_v45, %v700_v23 }
 0x6d2   : > { %v719_v48 = vmul.f32 %v718_v44, %v717_v47 }
 0x6d4   : > { %v721_v49 = vadd.f32 %v720_v46, %v719_v48 }
 0x6d6   : > { %v722_v50 = vadd.f32 %v721_v49, %v1350_v4  ;;  %v1015_v4 = vld [vmem:[%s1505_s5] ss:$0 sm:$0xff] }
 0x6d8   : > { %936 = vmatmul.msk.f32.vlgmr.msra.gmra.mxu3 %vm348_vm0, %v722_v50 }
 0x75b   : > { %v751_v54 = vpop.f32.mrf.mxu3 }
 0x75c   : > { %v752_v55 = vadd.f32 %v1015_v4, %v751_v54 }
 0x75e   : > { %v754_v56 = vmax.f32 %v752_v55, 0.0 }
 0x760   : > { %937 = vmatmul.msk.f32.vlgmr.msrb.gmra.mxu0 %vm764_vm10, %v754_v56 }
 0x7dd   : > { %v785_v58 = vpop.f32.mrf.mxu0 }
 0x7de   : > { %v786_v59 = vadd.f32 %v785_v58, %v763_v57 }
 0x7e0   : > { %v788_v60 = vsel %vm348_vm0, %v786_v59, 0.0 }
 0x7e1   : > { %789 = vadd.xlane.f32.xlu0 %v788_v60 }
 0x854   : > { %v790_v61 = vpop.xlane.xlu0 %789 }
 0x855   : > { %v791_v62 = vmul.f32 %v790_v61, %v1409_v20 }
 0x857   : > { %v792_v63 = vsub.f32 %v786_v59, %v791_v62 }
 0x859   : > { %v793_v0 = vmul.f32 %v792_v63, %v792_v63 }
 0x85b   : > { %v794_v1 = vsel %vm348_vm0, %v793_v0, 0.0 }
 0x85c   : > { %795 = vadd.xlane.f32.xlu1 %v794_v1 }
 0x8cf   : > { %v796_v2 = vpop.xlane.xlu1 %795 }
 0x8d0   : > { %v797_v3 = vmul.f32 %v796_v2, %v1409_v20 }
 0x8d2   : > { %v798_v5 = vadd.f32 1e-05, %v797_v3 }
 0x8d4   : > { %1036 = vrsqrt.f32 %v798_v5  ;;  %vm805_vm12 = vweird.f32 %v798_v5 }
 0x8da   : > { %v1037_v6 = vpop.eup %1036 }
 0x8db   : > { %v800_v7 = vmul.f32 %v1037_v6, %v798_v5  ;;  %vm806_vm11 = vweird.f32 %v1037_v6 }
 0x8dc   : > { %vm807_vm13 = vmor %vm805_vm12, %vm806_vm11 }
 0x8dd   : > { %v801_v8 = vmul.f32 %v1037_v6, %v800_v7 }
 0x8df   : > { %v802_v10 = vmul.f32 0.5, %v801_v8 }
 0x8e1   : > { %v803_v11 = vsub.f32 1.5, %v802_v10 }
 0x8e3   : > { %v804_v12 = vmul.f32 %v1037_v6, %v803_v11 }
 0x8e5   : > { %v808_v14 = vsel %vm807_vm13, %v1037_v6, %v804_v12 }
 0x8e6   : > { %v809_v16 = vmul.f32 %v808_v14, %v792_v63 }
 0x8e8   : > { %v811_v17 = vmul.f32 %v810_v13, %v809_v16 }
 0x8ea   : > { %v813_v18 = vadd.f32 %v812_v15, %v811_v17 }
 0x8ec   : > { %v814_v19 = vadd.f32 %v813_v18, %v722_v50 }
 0x8ee   : > { %815 = vst.msk [vmem:[%s337_s14] sm:$0xff] %vm348_vm0, %v814_v19 }
 0x8ef   : > { %1125 = shalt.err (!%p1122_p11)
}
 0x8f0   : > { %948 = dma.vmem_to_hbm [thread:$0]  (%p1297_p3), %s830_s25, 128, %s832_s7, %s817_s9  }
 0x8f1 PF: > { %s843_s24 = sand.u32 1, %s1156_s27   ;;  %p1517_p12 = scmp.ge.s32.totalorder %s1168_s30, 2 }
 0x8f2   : > { %s844_s11 = scalar_lea.sflag [#allocation6], %s843_s24 }
 0x8f3   : > { %p959_p13 = pnand %p1517_p12, %p1266_p6 }
 0x8f5   : > { %p960_p0 = pneg %p959_p13 }
 0x8f7   : > { %1151 = dma.done.wait (%p960_p0), %s844_s11, 128  }
 0x8f8   : > { %1153 = vsyncadd (%p960_p0), %s844_s11, 4294967168  ;;  %s1518_s10 = sld [smem:[#allocation13_spill]]  ;;  %p22_p5 = scmp.ge.s32.totalorder %s1284_s19, 4  }
 0x8f9   : > { %s1519_s27 = smov %s1160_s28  ;;  %s1520_s28 = smov %s1164_s29 }
 0x8fa   : > { %s1522_s30 = smov %s1284_s19  ;;  %24 = sbr.rel (!%p22_p5) target bundleno = 8 (0x8), region = 101 }
 0x8fe   : > { %s1521_s29 = smov %s1518_s10 }
 0x8ff   :  { %850 = vsyncpa [#allocation5], 1 }
 0x900   :  { %852 = vsyncpa [#allocation5 + $0x1], 1 }
 0x901   :  { %853 = vsyncpa [#allocation8], 1 }
 0x902   :  { %854 = vsyncpa [#allocation6], 1 }
 0x903   :  { %856 = vsyncpa [#allocation6 + $0x1], 1 }

</bundles_post_ra>
